<compile_context>
chip_gen: v5e
topology: v5e:2x2
jax: 0.10.0
libtpu: 0.0.40
codegen_flags: <defaults>
</compile_context>

<pallas_src>
import math
import numpy as np
import jax
import jax.numpy as jnp
from jax import lax
from jax.experimental import pallas as pl
from jax.experimental.pallas import tpu as pltpu

# ---- model config ('tiny' size, scaled-down bag) -----------------------------
L, D1, D2 = 192, 128, 128          # size_dict['tiny']
N_CLASSES = 2
NUM_TOKENS = 4                     # dfp['number_prompts']
N_PATCHES = 128                    # bag size (full lane tile for A_raw)

# packed parameter row layout: [b_fc | b_a||b_b | W_c | b_cls | b_c]
_OFF_BFC = 0
_OFF_BAB = _OFF_BFC + D1
_OFF_WC = _OFF_BAB + 2 * D2
_OFF_BCLS = _OFF_WC + D2
_OFF_BC = _OFF_BCLS + N_CLASSES
PACKED_W = _OFF_BC + 1                       # 515

# packed output row layout: [M | logits | Y_prob | Y_hat]
_OUT_M = 0
_OUT_LOGITS = _OUT_M + D1
_OUT_PROB = _OUT_LOGITS + N_CLASSES
_OUT_YHAT = _OUT_PROB + N_CLASSES
OUT_W = _OUT_YHAT + 1                        # 133


def clam_kernel(h_ref, pmean_ref, wfc_ref, wab_ref, wcls_ref, packed_ref,
                a_raw_ref, out_ref):
    # static lane slices of the packed parameter row
    bfc = packed_ref[:, _OFF_BFC:_OFF_BFC + D1]               # (1, D1)
    bab = packed_ref[:, _OFF_BAB:_OFF_BAB + 2 * D2]           # (1, 2*D2)
    wc = packed_ref[:, _OFF_WC:_OFF_WC + D2]                  # (1, D2)
    bcls = packed_ref[:, _OFF_BCLS:_OFF_BCLS + N_CLASSES]     # (1, C)
    bc = packed_ref[:, _OFF_BC:_OFF_BC + 1]                   # (1, 1)

    # forward_prompt, aggregation='add': mean_t(h + prompt[t]) == h + mean_t(prompt)
    h = h_ref[...] + pmean_ref[...]                                             # (N, L)

    # attention_net stage 1: Linear(L, D1) + ReLU
    h1 = jnp.maximum(
        jnp.dot(h, wfc_ref[...], preferred_element_type=jnp.float32) + bfc,
        0.0)                                                                    # (N, D1)

    # fused gated attention: one (N, D1) @ (D1, 2*D2) matmul, slice lanes
    ab = jnp.dot(h1, wab_ref[...], preferred_element_type=jnp.float32) + bab
    a = jnp.tanh(ab[:, :D2])
    b = jax.nn.sigmoid(ab[:, D2:])
    gated = a * b                                                               # (N, D2)

    # attention_c: contract W_c (1, D2) against gated (N, D2) -> lane-dense (1, N)
    scores = lax.dot_general(wc, gated, (((1,), (1,)), ((), ())),
                             preferred_element_type=jnp.float32) + bc           # (1, N)
    a_raw_ref[...] = scores

    # softmax over patches (whole bag resident); approx reciprocal is fine here
    smax = jnp.max(scores, axis=1, keepdims=True)
    p = jnp.exp(scores - smax)                                                  # (1, N)
    a_soft = p * pl.reciprocal(jnp.sum(p, axis=1, keepdims=True), approx=True)

    # attention-weighted pooling on the MXU: M = softmax(A) @ h1
    M = jnp.dot(a_soft, h1, preferred_element_type=jnp.float32)                 # (1, D1)

    # bag classifier + exact class softmax (calibrated probabilities)
    logits = jnp.dot(M, wcls_ref[...], preferred_element_type=jnp.float32) + bcls
    lmax = jnp.max(logits, axis=1, keepdims=True)
    el = jnp.exp(logits - lmax)
    y_prob = el / jnp.sum(el, axis=1, keepdims=True)

    # Y_hat = argmax over classes (first max index, matches torch.topk(..., 1))
    idx = lax.broadcasted_iota(jnp.int32, logits.shape, 1)                      # (1, C)
    y_hat_i = jnp.min(jnp.where(logits == lmax, idx, N_CLASSES),
                      axis=1, keepdims=True)                                    # (1, 1)

    # packed output row: [M | logits | Y_prob | Y_hat]
    out_ref[:, _OUT_M:_OUT_M + D1] = M
    out_ref[:, _OUT_LOGITS:_OUT_LOGITS + N_CLASSES] = logits
    out_ref[:, _OUT_PROB:_OUT_PROB + N_CLASSES] = y_prob
    out_ref[:, _OUT_YHAT:_OUT_YHAT + 1] = y_hat_i.astype(jnp.float32)


def prepare_params(params):
    """One-time operand fusion / packing (hoisted out of the per-call path)."""
    wab = jnp.concatenate([params["wa"], params["wb"]], axis=1)       # (D1, 2*D2)
    pmean = jnp.mean(params["prompt"], axis=0, keepdims=True)          # (1, L)
    packed_row = jnp.concatenate([
        params["bfc"],                      # lanes [0, 128)
        params["ba"], params["bb"],         # lanes [128, 384)
        params["wc"],                       # lanes [384, 512)
        params["bcls"],                     # lanes [512, 514)
        params["bc"],                       # lane 514
    ], axis=1)                                                          # (1, 515)
    return {
        "pmean": pmean,
        "wfc": params["wfc"],
        "wab": wab,
        "wcls": params["wcls"],
        "packed": packed_row,
    }


@jax.jit
def clam_sb_prompted_forward(h, prepared):
    n = h.shape[0]

    out_shapes = (
        jax.ShapeDtypeStruct((1, n), jnp.float32),        # A_raw (lane-dense row)
        jax.ShapeDtypeStruct((1, OUT_W), jnp.float32),    # packed M|logits|Y_prob|Y_hat
    )
    in_specs = [
        pl.BlockSpec((n, L), lambda i: (0, 0)),             # h (whole bag)
        pl.BlockSpec((1, L), lambda i: (0, 0)),             # prompt mean
        pl.BlockSpec((L, D1), lambda i: (0, 0)),            # W_fc
        pl.BlockSpec((D1, 2 * D2), lambda i: (0, 0)),       # W_a || W_b (fused)
        pl.BlockSpec((D1, N_CLASSES), lambda i: (0, 0)),    # W_cls
        pl.BlockSpec((1, PACKED_W), lambda i: (0, 0)),      # packed biases + W_c + b_c
    ]
    out_specs = (
        pl.BlockSpec((1, n), lambda i: (0, 0)),
        pl.BlockSpec((1, OUT_W), lambda i: (0, 0)),
    )

    a_raw, packed_out = pl.pallas_call(
        clam_kernel,
        out_shape=out_shapes,
        grid_spec=pltpu.PrefetchScalarGridSpec(
            num_scalar_prefetch=0,
            grid=(1,),
            in_specs=in_specs,
            out_specs=out_specs,
        ),
        compiler_params=pltpu.CompilerParams(dimension_semantics=("arbitrary",)),
    )(h, prepared["pmean"], prepared["wfc"], prepared["wab"],
      prepared["wcls"], prepared["packed"])

    M = packed_out[:, _OUT_M:_OUT_M + D1]
    logits = packed_out[:, _OUT_LOGITS:_OUT_LOGITS + N_CLASSES]
    y_prob = packed_out[:, _OUT_PROB:_OUT_PROB + N_CLASSES]
    y_hat = packed_out[:, _OUT_YHAT:_OUT_YHAT + 1].astype(jnp.int32)
    results_dict = {}
    return logits, y_prob, y_hat, a_raw, results_dict, M


# ---- pure-JAX reference for correctness -------------------------------------
def reference_forward(h, params):
    pmean = jnp.mean(params["prompt"], axis=0, keepdims=True)
    hp = h + pmean
    h1 = jax.nn.relu(hp @ params["wfc"] + params["bfc"])
    a = jnp.tanh(h1 @ params["wa"] + params["ba"])
    b = jax.nn.sigmoid(h1 @ params["wb"] + params["bb"])
    A = (a * b) @ params["wc"].T + params["bc"]       # (N, 1)
    A_raw = A.T                                       # (1, N)
    A_soft = jax.nn.softmax(A_raw, axis=1)
    M = A_soft @ h1                                   # (1, D1)
    logits = M @ params["wcls"] + params["bcls"]      # (1, C)
    Y_prob = jax.nn.softmax(logits, axis=1)
    Y_hat = jnp.argmax(logits, axis=1, keepdims=True)
    return logits, Y_prob, Y_hat, A_raw, M


def make_params(key):
    ks = jax.random.split(key, 6)

    def xavier(k, fan_in, fan_out):
        std = math.sqrt(2.0 / (fan_in + fan_out))
        return (std * jax.random.normal(k, (fan_in, fan_out))).astype(jnp.float32)

    return {
        # dfp init='gaussian': N(0,1) prompt tokens, prompt_norm = Identity
        "prompt": jax.random.normal(ks[0], (NUM_TOKENS, L), dtype=jnp.float32),
        "wfc": xavier(ks[1], L, D1),  "bfc": jnp.zeros((1, D1), jnp.float32),
        "wa":  xavier(ks[2], D1, D2), "ba":  jnp.zeros((1, D2), jnp.float32),
        "wb":  xavier(ks[3], D1, D2), "bb":  jnp.zeros((1, D2), jnp.float32),
        "wc":  xavier(ks[4], D2, 1).T,                # stored (1, D2)
        "bc":  jnp.zeros((1, 1), jnp.float32),
        "wcls": xavier(ks[5], D1, N_CLASSES),
        "bcls": jnp.zeros((1, N_CLASSES), jnp.float32),
    }


if __name__ == "__main__":
    key = jax.random.PRNGKey(0)
    kp, kh = jax.random.split(key)
    params = make_params(kp)
    prepared = prepare_params(params)   # one-time fusion / packing
    h = jax.random.normal(kh, (N_PATCHES, L), dtype=jnp.float32)

    logits, y_prob, y_hat, A_raw, results, M = clam_sb_prompted_forward(h, prepared)
    jax.block_until_ready((logits, y_prob, y_hat, A_raw, M))

    with jax.default_matmul_precision("highest"):
        ref_logits, ref_prob, ref_hat, ref_A, ref_M = reference_forward(h, params)
        jax.block_until_ready((ref_logits, ref_prob, ref_hat, ref_A, ref_M))

    np.testing.assert_allclose(np.asarray(logits), np.asarray(ref_logits), rtol=2e-3, atol=2e-3)
    np.testing.assert_allclose(np.asarray(y_prob), np.asarray(ref_prob), rtol=2e-3, atol=2e-3)
    np.testing.assert_allclose(np.asarray(A_raw), np.asarray(ref_A), rtol=2e-3, atol=2e-3)
    np.testing.assert_allclose(np.asarray(M), np.asarray(ref_M), rtol=2e-3, atol=2e-3)
    assert int(np.asarray(y_hat)[0, 0]) == int(np.asarray(ref_hat)[0, 0])

    print("KERNEL_OK")
</pallas_src>

<mosaic_0001>
module attributes {stable_mosaic.version = 11 : i64} {
  func.func @clam_kernel(%arg0: i32, %arg1: memref<128x192xf32, #tpu.memory_space<vmem>>, %arg2: memref<1x192xf32, #tpu.memory_space<vmem>>, %arg3: memref<192x128xf32, #tpu.memory_space<vmem>>, %arg4: memref<128x256xf32, #tpu.memory_space<vmem>>, %arg5: memref<128x2xf32, #tpu.memory_space<vmem>>, %arg6: memref<1x515xf32, #tpu.memory_space<vmem>>, %arg7: memref<1x128xf32, #tpu.memory_space<vmem>>, %arg8: memref<1x133xf32, #tpu.memory_space<vmem>>) attributes {dimension_semantics = [#tpu.dimension_semantics<arbitrary>], iteration_bounds = array<i64: 1>, scalar_prefetch = 0 : i64, scratch_operands = 0 : i64, tpu.core_type = #tpu.core_type<tc>, window_params = [{pipeline_mode = #tpu.pipeline_mode<synchronous>, transform_indices = @transform_0, window_bounds = array<i64: 128, 192>}, {pipeline_mode = #tpu.pipeline_mode<synchronous>, transform_indices = @transform_1, window_bounds = array<i64: 1, 192>}, {pipeline_mode = #tpu.pipeline_mode<synchronous>, transform_indices = @transform_2, window_bounds = array<i64: 192, 128>}, {pipeline_mode = #tpu.pipeline_mode<synchronous>, transform_indices = @transform_3, window_bounds = array<i64: 128, 256>}, {pipeline_mode = #tpu.pipeline_mode<synchronous>, transform_indices = @transform_4, window_bounds = array<i64: 128, 2>}, {pipeline_mode = #tpu.pipeline_mode<synchronous>, transform_indices = @transform_5, window_bounds = array<i64: 1, 515>}, {pipeline_mode = #tpu.pipeline_mode<synchronous>, transform_indices = @transform_6, window_bounds = array<i64: 1, 128>}, {pipeline_mode = #tpu.pipeline_mode<synchronous>, transform_indices = @transform_7, window_bounds = array<i64: 1, 133>}]} {
    %c0 = arith.constant 0 : index
    %c0_0 = arith.constant 0 : index
    %0 = vector.load %arg6[%c0, %c0_0] : memref<1x515xf32, #tpu.memory_space<vmem>>, vector<1x128xf32>
    %c0_1 = arith.constant 0 : index
    %c128 = arith.constant 128 : index
    %1 = vector.load %arg6[%c0_1, %c128] : memref<1x515xf32, #tpu.memory_space<vmem>>, vector<1x256xf32>
    %c0_2 = arith.constant 0 : index
    %c384 = arith.constant 384 : index
    %2 = vector.load %arg6[%c0_2, %c384] : memref<1x515xf32, #tpu.memory_space<vmem>>, vector<1x128xf32>
    %c0_3 = arith.constant 0 : index
    %c512 = arith.constant 512 : index
    %3 = vector.load %arg6[%c0_3, %c512] : memref<1x515xf32, #tpu.memory_space<vmem>>, vector<1x2xf32>
    %c0_4 = arith.constant 0 : index
    %c514 = arith.constant 514 : index
    %4 = vector.load %arg6[%c0_4, %c514] : memref<1x515xf32, #tpu.memory_space<vmem>>, vector<1x1xf32>
    %c0_5 = arith.constant 0 : index
    %c0_6 = arith.constant 0 : index
    %5 = vector.load %arg1[%c0_5, %c0_6] : memref<128x192xf32, #tpu.memory_space<vmem>>, vector<128x192xf32>
    %c0_7 = arith.constant 0 : index
    %c0_8 = arith.constant 0 : index
    %6 = vector.load %arg2[%c0_7, %c0_8] : memref<1x192xf32, #tpu.memory_space<vmem>>, vector<1x192xf32>
    %7 = vector.broadcast %6 : vector<1x192xf32> to vector<128x192xf32>
    %8 = arith.addf %5, %7 : vector<128x192xf32>
    %c0_9 = arith.constant 0 : index
    %c0_10 = arith.constant 0 : index
    %9 = vector.load %arg3[%c0_9, %c0_10] : memref<192x128xf32, #tpu.memory_space<vmem>>, vector<192x128xf32>
    %cst = arith.constant dense<0.000000e+00> : vector<128x128xf32>
    %10 = tpu.matmul %8, %9, %cst {dimension_numbers = #tpu.dot_dimension_numbers<[1], [0], [0], [1], [0, 0, 1, 1], [], []>} : vector<128x192xf32>, vector<192x128xf32>, vector<128x128xf32> -> vector<128x128xf32>
    %11 = vector.broadcast %0 : vector<1x128xf32> to vector<128x128xf32>
    %12 = arith.addf %10, %11 : vector<128x128xf32>
    %cst_11 = arith.constant 0.000000e+00 : f32
    %13 = vector.broadcast %cst_11 : f32 to vector<128x128xf32>
    %14 = arith.maximumf %12, %13 : vector<128x128xf32>
    %c0_12 = arith.constant 0 : index
    %c0_13 = arith.constant 0 : index
    %15 = vector.load %arg4[%c0_12, %c0_13] : memref<128x256xf32, #tpu.memory_space<vmem>>, vector<128x256xf32>
    %cst_14 = arith.constant dense<0.000000e+00> : vector<128x256xf32>
    %16 = tpu.matmul %14, %15, %cst_14 {dimension_numbers = #tpu.dot_dimension_numbers<[1], [0], [0], [1], [0, 0, 1, 1], [], []>} : vector<128x128xf32>, vector<128x256xf32>, vector<128x256xf32> -> vector<128x256xf32>
    %17 = vector.broadcast %1 : vector<1x256xf32> to vector<128x256xf32>
    %18 = arith.addf %16, %17 : vector<128x256xf32>
    %19 = vector.extract_strided_slice %18 {offsets = [0, 0], sizes = [128, 128], strides = [1, 1]} : vector<128x256xf32> to vector<128x128xf32>
    %20 = math.tanh %19 : vector<128x128xf32>
    %21 = vector.extract_strided_slice %18 {offsets = [0, 128], sizes = [128, 128], strides = [1, 1]} : vector<128x256xf32> to vector<128x128xf32>
    %22 = arith.negf %21 : vector<128x128xf32>
    %23 = math.exp %22 : vector<128x128xf32>
    %cst_15 = arith.constant 1.000000e+00 : f32
    %24 = vector.broadcast %cst_15 : f32 to vector<128x128xf32>
    %25 = arith.addf %24, %23 : vector<128x128xf32>
    %26 = arith.divf %24, %25 : vector<128x128xf32>
    %27 = arith.mulf %20, %26 : vector<128x128xf32>
    %cst_16 = arith.constant dense<0.000000e+00> : vector<1x128xf32>
    %28 = tpu.matmul %2, %27, %cst_16 {dimension_numbers = #tpu.dot_dimension_numbers<[1], [1], [0], [0], [0, 0, 1, 0], [], []>} : vector<1x128xf32>, vector<128x128xf32>, vector<1x128xf32> -> vector<1x128xf32>
    %29 = vector.broadcast %4 : vector<1x1xf32> to vector<1x128xf32>
    %30 = arith.addf %28, %29 : vector<1x128xf32>
    %c0_17 = arith.constant 0 : index
    %c0_18 = arith.constant 0 : index
    %31 = vector.load %arg7[%c0_17, %c0_18] : memref<1x128xf32, #tpu.memory_space<vmem>>, vector<1x128xf32>
    tpu.vector_store %arg7[%c0_17, %c0_18], %30 {strides = array<i32>} : memref<1x128xf32, #tpu.memory_space<vmem>>, vector<1x128xf32>,
    %cst_19 = arith.constant dense<0xFF800000> : vector<1xf32>
    %32 = vector.multi_reduction <maximumf>, %30, %cst_19 [1] : vector<1x128xf32> to vector<1xf32>
    %33 = vector.shape_cast %32 : vector<1xf32> to vector<1x1xf32>
    %34 = vector.broadcast %33 : vector<1x1xf32> to vector<1x128xf32>
    %35 = arith.subf %30, %34 : vector<1x128xf32>
    %36 = math.exp %35 : vector<1x128xf32>
    %cst_20 = arith.constant dense<0.000000e+00> : vector<1xf32>
    %37 = vector.multi_reduction <add>, %36, %cst_20 [1] : vector<1x128xf32> to vector<1xf32>
    %38 = vector.shape_cast %37 : vector<1xf32> to vector<1x1xf32>
    %39 = tpu.reciprocal %38 {approx = true} : vector<1x1xf32> -> vector<1x1xf32>
    %40 = vector.broadcast %39 : vector<1x1xf32> to vector<1x128xf32>
    %41 = arith.mulf %36, %40 : vector<1x128xf32>
    %cst_21 = arith.constant dense<0.000000e+00> : vector<1x128xf32>
    %42 = tpu.matmul %41, %14, %cst_21 {dimension_numbers = #tpu.dot_dimension_numbers<[1], [0], [0], [1], [0, 0, 1, 1], [], []>} : vector<1x128xf32>, vector<128x128xf32>, vector<1x128xf32> -> vector<1x128xf32>
    %c0_22 = arith.constant 0 : index
    %c0_23 = arith.constant 0 : index
    %43 = vector.load %arg5[%c0_22, %c0_23] : memref<128x2xf32, #tpu.memory_space<vmem>>, vector<128x2xf32>
    %cst_24 = arith.constant dense<0.000000e+00> : vector<1x2xf32>
    %44 = tpu.matmul %42, %43, %cst_24 {dimension_numbers = #tpu.dot_dimension_numbers<[1], [0], [0], [1], [0, 0, 1, 1], [], []>} : vector<1x128xf32>, vector<128x2xf32>, vector<1x2xf32> -> vector<1x2xf32>
    %45 = arith.addf %44, %3 : vector<1x2xf32>
    %cst_25 = arith.constant dense<0xFF800000> : vector<1xf32>
    %46 = vector.multi_reduction <maximumf>, %45, %cst_25 [1] : vector<1x2xf32> to vector<1xf32>
    %47 = vector.shape_cast %46 : vector<1xf32> to vector<1x1xf32>
    %48 = vector.broadcast %47 : vector<1x1xf32> to vector<1x2xf32>
    %49 = arith.subf %45, %48 : vector<1x2xf32>
    %50 = math.exp %49 : vector<1x2xf32>
    %cst_26 = arith.constant dense<0.000000e+00> : vector<1xf32>
    %51 = vector.multi_reduction <add>, %50, %cst_26 [1] : vector<1x2xf32> to vector<1xf32>
    %52 = vector.shape_cast %51 : vector<1xf32> to vector<1x1xf32>
    %53 = vector.broadcast %52 : vector<1x1xf32> to vector<1x2xf32>
    %54 = arith.divf %50, %53 : vector<1x2xf32>
    %55 = tpu.iota {dimensions = array<i32: 1>} : vector<1x2xi32>
    %56 = vector.broadcast %47 : vector<1x1xf32> to vector<1x2xf32>
    %57 = arith.cmpf oeq, %45, %56 : vector<1x2xf32>
    %c2_i32 = arith.constant 2 : i32
    %58 = vector.broadcast %c2_i32 : i32 to vector<1x2xi32>
    %59 = arith.select %57, %55, %58 : vector<1x2xi1>, vector<1x2xi32>
    %cst_27 = arith.constant dense<2147483647> : vector<1xi32>
    %60 = vector.multi_reduction <minsi>, %59, %cst_27 [1] : vector<1x2xi32> to vector<1xi32>
    %61 = vector.shape_cast %60 : vector<1xi32> to vector<1x1xi32>
    %c0_28 = arith.constant 0 : index
    %c0_29 = arith.constant 0 : index
    %62 = vector.load %arg8[%c0_28, %c0_29] : memref<1x133xf32, #tpu.memory_space<vmem>>, vector<1x128xf32>
    tpu.vector_store %arg8[%c0_28, %c0_29], %42 {strides = array<i32>} : memref<1x133xf32, #tpu.memory_space<vmem>>, vector<1x128xf32>,
    %c0_30 = arith.constant 0 : index
    %c128_31 = arith.constant 128 : index
    %63 = vector.load %arg8[%c0_30, %c128_31] : memref<1x133xf32, #tpu.memory_space<vmem>>, vector<1x2xf32>
    tpu.vector_store %arg8[%c0_30, %c128_31], %45 {strides = array<i32>} : memref<1x133xf32, #tpu.memory_space<vmem>>, vector<1x2xf32>,
    %c0_32 = arith.constant 0 : index
    %c130 = arith.constant 130 : index
    %64 = vector.load %arg8[%c0_32, %c130] : memref<1x133xf32, #tpu.memory_space<vmem>>, vector<1x2xf32>
    tpu.vector_store %arg8[%c0_32, %c130], %54 {strides = array<i32>} : memref<1x133xf32, #tpu.memory_space<vmem>>, vector<1x2xf32>,
    %65 = arith.sitofp %61 : vector<1x1xi32> to vector<1x1xf32>
    %c0_33 = arith.constant 0 : index
    %c132 = arith.constant 132 : index
    %66 = vector.load %arg8[%c0_33, %c132] : memref<1x133xf32, #tpu.memory_space<vmem>>, vector<1x1xf32>
    tpu.vector_store %arg8[%c0_33, %c132], %65 {strides = array<i32>} : memref<1x133xf32, #tpu.memory_space<vmem>>, vector<1x1xf32>,
    return
  }
  func.func @transform_0(%arg0: i32) -> (i32, i32) {
    %c0_i32 = arith.constant 0 : i32
    %c0_i32_0 = arith.constant 0 : i32
    %c0_i32_1 = arith.constant 0 : i32
    return %c0_i32, %c0_i32_0 : i32, i32
  }
  func.func @transform_1(%arg0: i32) -> (i32, i32) {
    %c0_i32 = arith.constant 0 : i32
    %c0_i32_0 = arith.constant 0 : i32
    %c0_i32_1 = arith.constant 0 : i32
    return %c0_i32, %c0_i32_0 : i32, i32
  }
  func.func @transform_2(%arg0: i32) -> (i32, i32) {
    %c0_i32 = arith.constant 0 : i32
    %c0_i32_0 = arith.constant 0 : i32
    %c0_i32_1 = arith.constant 0 : i32
    return %c0_i32, %c0_i32_0 : i32, i32
  }
  func.func @transform_3(%arg0: i32) -> (i32, i32) {
    %c0_i32 = arith.constant 0 : i32
    %c0_i32_0 = arith.constant 0 : i32
    %c0_i32_1 = arith.constant 0 : i32
    return %c0_i32, %c0_i32_0 : i32, i32
  }
  func.func @transform_4(%arg0: i32) -> (i32, i32) {
    %c0_i32 = arith.constant 0 : i32
    %c0_i32_0 = arith.constant 0 : i32
    %c0_i32_1 = arith.constant 0 : i32
    return %c0_i32, %c0_i32_0 : i32, i32
  }
  func.func @transform_5(%arg0: i32) -> (i32, i32) {
    %c0_i32 = arith.constant 0 : i32
    %c0_i32_0 = arith.constant 0 : i32
    %c0_i32_1 = arith.constant 0 : i32
    return %c0_i32, %c0_i32_0 : i32, i32
  }
  func.func @transform_6(%arg0: i32) -> (i32, i32) {
    %c0_i32 = arith.constant 0 : i32
    %c0_i32_0 = arith.constant 0 : i32
    %c0_i32_1 = arith.constant 0 : i32
    return %c0_i32, %c0_i32_0 : i32, i32
  }
  func.func @transform_7(%arg0: i32) -> (i32, i32) {
    %c0_i32 = arith.constant 0 : i32
    %c0_i32_0 = arith.constant 0 : i32
    %c0_i32_1 = arith.constant 0 : i32
    return %c0_i32, %c0_i32_0 : i32, i32
  }
}

</mosaic_0001>

<bundles_post_ra>
// kernel: clam_sb_prompted_forward.1
= control target key start
LH: loop header
LB: loop body
LE: loop exit
PB: predicated region body
PF: predicated region fallthrough
CT: control target
= control target key end

     0   :  { %s1856_s0 = inlined_call_operand.vmem [shape: f32[128,192], index: 0, kind: input, shape index: {}]   ;;  %s1857_s1 = inlined_call_operand.vmem [shape: f32[1,192], index: 1, kind: input, shape index: {}]   ;;  %s1858_s2 = inlined_call_operand.vmem [shape: f32[192,128], index: 2, kind: input, shape index: {}]   ;;  %s1859_s3 = inlined_call_operand.vmem [shape: f32[128,256], index: 3, kind: input, shape index: {}]   ;;  %s1860_s4 = inlined_call_operand.vmem [shape: f32[128,2], index: 4, kind: input, shape index: {}]   ;;  %s1861_s5 = inlined_call_operand.vmem [shape: f32[1,515], index: 5, kind: input, shape index: {}]   ;;  %s1862_s6 = inlined_call_operand.hbm [shape: f32[1,128], index: 6, kind: output, shape index: {0}]   ;;  %s1863_s7 = inlined_call_operand.vmem [shape: f32[1,133], index: 7, kind: output, shape index: {1}]  }
   0x1   :  { %v115_v0 = vld [vmem:[%s1858_s2 + $0x78] sm:$0xff]  ;;  %v114_v1 = vld [vmem:[%s1858_s2 + $0x70] sm:$0xff]  ;;  %v113_v2 = vld [vmem:[%s1858_s2 + $0x68] sm:$0xff] }
   0x2   :  { %176 = vmatpush.msra.mxu0 %v115_v0  ;;  %v123_v3 = vld [vmem:[%s1858_s2 + $0xb8] sm:$0xff]  ;;  %v112_v4 = vld [vmem:[%s1858_s2 + $0x60] sm:$0xff]  ;;  %v122_v5 = vld [vmem:[%s1858_s2 + $0xb0] sm:$0xff] }
   0x3   :  { %249 = vmatpush.msra.mxu1 %v123_v3  ;;  %v121_v6 = vld [vmem:[%s1858_s2 + $0xa8] sm:$0xff]  ;;  %v111_v7 = vld [vmem:[%s1858_s2 + $0x58] sm:$0xff]  ;;  %v120_v8 = vld [vmem:[%s1858_s2 + $0xa0] sm:$0xff] }
   0x4   :  { %177 = vmatpush.msra.mxu0 %v114_v1  ;;  %v110_v9 = vld [vmem:[%s1858_s2 + $0x50] sm:$0xff]  ;;  %v109_v10 = vld [vmem:[%s1858_s2 + $0x48] sm:$0xff]  ;;  %v119_v11 = vld [vmem:[%s1858_s2 + $0x98] sm:$0xff] }
   0x5   :  { %250 = vmatpush.msra.mxu1 %v122_v5  ;;  %v62_v12 = vld [vmem:[%s1857_s1] sm:$0x3] }
   0x6   :  { %178 = vmatpush.msra.mxu0 %v113_v2 }
   0x7   :  { %251 = vmatpush.msra.mxu1 %v121_v6 }
   0x8   :  { %179 = vmatpush.msra.mxu0 %v112_v4 }
   0x9   :  { %252 = vmatpush.msra.mxu1 %v120_v8 }
   0xa   :  { %180 = vmatpush.msra.mxu0 %v111_v7 }
   0xb   :  { %13 = vsyncpa [#allocation3], 0  ;;  %v118_v13 = vld [vmem:[%s1858_s2 + $0x90] sm:$0xff]  ;;  %v1257_v14 = vperm.slane %v62_v12, 1  ;;  %v108_v15 = vld [vmem:[%s1858_s2 + $0x40] sm:$0xff]  ;;  %253 = vmatpush.msra.mxu1 %v119_v11  ;;  %vm127_vm0 = vcmask 523264  }
   0xc   :  { %181 = vmatpush.msra.mxu0 %v110_v9  ;;  %v31_v16 = vld [vmem:[%s1856_s0 + $0x8] sm:$0xff]  ;;  %v107_v18 = vld [vmem:[%s1858_s2 + $0x38] sm:$0xff]  ;;  %v116_v19 = vld [vmem:[%s1858_s2 + $0x80] sm:$0xff]  ;;  %v1295_v28 = vperm.slane %v62_v12, 0  ;;  %s992_s21 = sshll.u32 %s1862_s6, 4  ;;  %s1174_s6 = smov 2   ;;  %s993_s21 = int_to_ptr.hbm [resolvable:$true] %s992_s21 }
   0xd   :  { %v117_v17 = vld [vmem:[%s1858_s2 + $0x88] sm:$0xff]  ;;  %254 = vmatpush.msra.mxu1 %v118_v13  ;;  %v69_v20 = vadd.f32 %v1257_v14, %v31_v16  ;;  %v106_v21 = vld [vmem:[%s1858_s2 + $0x30] sm:$0xff]  ;;  %v104_v23 = vld [vmem:[%s1858_s2 + $0x20] sm:$0xff] }
   0xe   :  { %182 = vmatpush.msra.mxu0 %v109_v10  ;;  %v105_v22 = vld [vmem:[%s1858_s2 + $0x28] sm:$0xff]  ;;  %v33_v24 = vld [vmem:[%s1856_s0 + $0x18] sm:$0xff]  ;;  %v102_v27 = vld [vmem:[%s1858_s2 + $0x10] sm:$0xff] }
   0xf   :  { %255 = vmatpush.msra.mxu1 %v117_v17  ;;  %v103_v25 = vld [vmem:[%s1858_s2 + $0x18] sm:$0xff]  ;;  %v71_v26 = vadd.f32 %v1257_v14, %v33_v24  ;;  %v30_v29 = vld [vmem:[%s1856_s0] sm:$0xff]  ;;  %v101_v30 = vld [vmem:[%s1858_s2 + $0x8] sm:$0xff] }
  0x10   :  { %183 = vmatpush.msra.mxu0 %v108_v15  ;;  %v100_v31 = vld [vmem:[%s1858_s2] sm:$0xff]  ;;  %v68_v32 = vadd.f32 %v1295_v28, %v30_v29  ;;  %v35_v33 = vld [vmem:[%s1856_s0 + $0x28] sm:$0xff]  ;;  %v32_v35 = vld [vmem:[%s1856_s0 + $0x10] sm:$0xff] }
  0x11   :  { %256 = vmatpush.msra.mxu1 %v116_v19  ;;  %v73_v34 = vadd.f32 %v1257_v14, %v35_v33  ;;  %v70_v36 = vadd.f32 %v1295_v28, %v32_v35  ;;  %v37_v37 = vld [vmem:[%s1856_s0 + $0x38] sm:$0xff]  ;;  %v34_v39 = vld [vmem:[%s1856_s0 + $0x20] sm:$0xff]  ;;  %v39_v41 = vld [vmem:[%s1856_s0 + $0x48] sm:$0xff] }
  0x12   :  { %184 = vmatpush.msra.mxu0 %v107_v18  ;;  %1005 = vmatmul.msk.f32.vlgmr.msra.gmra.mxu1 %vm127_vm0, %v69_v20  ;;  %v75_v38 = vadd.f32 %v1257_v14, %v37_v37  ;;  %v72_v40 = vadd.f32 %v1295_v28, %v34_v39  ;;  %v77_v42 = vadd.f32 %v1257_v14, %v39_v41  ;;  %v36_v43 = vld [vmem:[%s1856_s0 + $0x30] sm:$0xff]  ;;  %v41_v45 = vld [vmem:[%s1856_s0 + $0x58] sm:$0xff]  ;;  %v38_v47 = vld [vmem:[%s1856_s0 + $0x40] sm:$0xff] }
  0x13   :  { %v74_v44 = vadd.f32 %v1295_v28, %v36_v43  ;;  %v79_v46 = vadd.f32 %v1257_v14, %v41_v45  ;;  %v76_v48 = vadd.f32 %v1295_v28, %v38_v47  ;;  %v43_v49 = vld [vmem:[%s1856_s0 + $0x68] sm:$0xff]  ;;  %v40_v51 = vld [vmem:[%s1856_s0 + $0x50] sm:$0xff]  ;;  %v45_v53 = vld [vmem:[%s1856_s0 + $0x78] sm:$0xff] }
  0x14   :  { %185 = vmatpush.msra.mxu0 %v106_v21  ;;  %v81_v50 = vadd.f32 %v1257_v14, %v43_v49  ;;  %v78_v52 = vadd.f32 %v1295_v28, %v40_v51  ;;  %v83_v54 = vadd.f32 %v1257_v14, %v45_v53  ;;  %v42_v55 = vld [vmem:[%s1856_s0 + $0x60] sm:$0xff]  ;;  %v47_v57 = vld [vmem:[%s1856_s0 + $0x88] sm:$0xff]  ;;  %v44_v59 = vld [vmem:[%s1856_s0 + $0x70] sm:$0xff] }
  0x15   :  { %v80_v56 = vadd.f32 %v1295_v28, %v42_v55  ;;  %v85_v58 = vadd.f32 %v1257_v14, %v47_v57  ;;  %v82_v60 = vadd.f32 %v1295_v28, %v44_v59  ;;  %v49_v61 = vld [vmem:[%s1856_s0 + $0x98] sm:$0xff]  ;;  %v46_v63 = vld [vmem:[%s1856_s0 + $0x80] sm:$0xff]  ;;  %v51_v1 = vld [vmem:[%s1856_s0 + $0xa8] sm:$0xff] }
  0x16   :  { %186 = vmatpush.msra.mxu0 %v105_v22  ;;  %v87_v62 = vadd.f32 %v1257_v14, %v49_v61  ;;  %v84_v0 = vadd.f32 %v1295_v28, %v46_v63  ;;  %v89_v2 = vadd.f32 %v1257_v14, %v51_v1  ;;  %v352_v3 = vld [vmem:[%s1859_s3 + $0xf0] sm:$0xff]  ;;  %v353_v4 = vld [vmem:[%s1859_s3 + $0xf8] sm:$0xff]  ;;  %v350_v5 = vld [vmem:[%s1859_s3 + $0xe0] sm:$0xff] }
  0x17   :  { %v48_v6 = vld [vmem:[%s1856_s0 + $0x90] sm:$0xff]  ;;  %359 = vmatpush.msra.mxu2 %v352_v3  ;;  %424 = vmatpush.msra.mxu3 %v353_v4  ;;  %v351_v7 = vld [vmem:[%s1859_s3 + $0xe8] sm:$0xff]  ;;  %v53_v9 = vld [vmem:[%s1856_s0 + $0xb8] sm:$0xff] }
  0x18   :  { %187 = vmatpush.msra.mxu0 %v104_v23  ;;  %v86_v8 = vadd.f32 %v1295_v28, %v48_v6  ;;  %v91_v10 = vadd.f32 %v1257_v14, %v53_v9  ;;  %v348_v11 = vld [vmem:[%s1859_s3 + $0xd0] sm:$0xff]  ;;  %v349_v12 = vld [vmem:[%s1859_s3 + $0xd8] sm:$0xff]  ;;  %v346_v13 = vld [vmem:[%s1859_s3 + $0xc0] sm:$0xff] }
  0x19   :  { %360 = vmatpush.msra.mxu2 %v350_v5  ;;  %425 = vmatpush.msra.mxu3 %v351_v7  ;;  %v50_v15 = vld [vmem:[%s1856_s0 + $0xa0] sm:$0xff]  ;;  %v347_v16 = vld [vmem:[%s1859_s3 + $0xc8] sm:$0xff]  ;;  %v344_v17 = vld [vmem:[%s1859_s3 + $0xb0] sm:$0xff] }
  0x1a   :  { %188 = vmatpush.msra.mxu0 %v103_v25  ;;  %1006 = vmatmul.msk.f32.gmra.mxu1 %vm127_vm0, %v71_v26  ;;  %v345_v18 = vld [vmem:[%s1859_s3 + $0xb8] sm:$0xff]  ;;  %v88_v19 = vadd.f32 %v1295_v28, %v50_v15  ;;  %v55_v20 = vld [vmem:[%s1856_s0 + $0xc8] sm:$0xff]  ;;  %v342_v21 = vld [vmem:[%s1859_s3 + $0xa0] sm:$0xff] }
  0x1b   :  { %361 = vmatpush.msra.mxu2 %v348_v11  ;;  %426 = vmatpush.msra.mxu3 %v349_v12  ;;  %v343_v22 = vld [vmem:[%s1859_s3 + $0xa8] sm:$0xff]  ;;  %v93_v23 = vadd.f32 %v1257_v14, %v55_v20  ;;  %v340_v24 = vld [vmem:[%s1859_s3 + $0x90] sm:$0xff]  ;;  %v341_v25 = vld [vmem:[%s1859_s3 + $0x98] sm:$0xff] }
  0x1c   :  { %189 = vmatpush.msra.mxu0 %v102_v27  ;;  %v338_v26 = vld [vmem:[%s1859_s3 + $0x80] sm:$0xff]  ;;  %v52_v27 = vld [vmem:[%s1856_s0 + $0xb0] sm:$0xff]  ;;  %v339_v29 = vld [vmem:[%s1859_s3 + $0x88] sm:$0xff] }
  0x1d   :  { %362 = vmatpush.msra.mxu2 %v346_v13  ;;  %427 = vmatpush.msra.mxu3 %v347_v16  ;;  %v57_v33 = vld [vmem:[%s1856_s0 + $0xd8] sm:$0xff]  ;;  %v335_v35 = vld [vmem:[%s1859_s3 + $0x68] sm:$0xff]  ;;  %v332_v37 = vld [vmem:[%s1859_s3 + $0x50] sm:$0xff] }
  0x1e   :  { %190 = vmatpush.msra.mxu0 %v101_v30  ;;  %v336_v30 = vld [vmem:[%s1859_s3 + $0x70] sm:$0xff]  ;;  %v330_v39 = vld [vmem:[%s1859_s3 + $0x40] sm:$0xff]  ;;  %v331_v41 = vld [vmem:[%s1859_s3 + $0x48] sm:$0xff] }
  0x1f   :  { %363 = vmatpush.msra.mxu2 %v344_v17  ;;  %428 = vmatpush.msra.mxu3 %v345_v18  ;;  %v59_v43 = vld [vmem:[%s1856_s0 + $0xe8] sm:$0xff]  ;;  %v329_v45 = vld [vmem:[%s1859_s3 + $0x38] sm:$0xff]  ;;  %v324_v49 = vld [vmem:[%s1859_s3 + $0x10] sm:$0xff] }
  0x20   :  { %191 = vmatpush.msra.mxu0 %v100_v31  ;;  %v337_v31 = vld [vmem:[%s1859_s3 + $0x78] sm:$0xff]  ;;  %v327_v47 = vld [vmem:[%s1859_s3 + $0x28] sm:$0xff]  ;;  %v56_v51 = vld [vmem:[%s1856_s0 + $0xd0] sm:$0xff] }
  0x21   :  { %192 = vmatmul.f32.vlgmr.msra.gmra.mxu0 %v68_v32  ;;  %364 = vmatpush.msra.mxu2 %v342_v21  ;;  %v90_v32 = vadd.f32 %v1295_v28, %v52_v27  ;;  %v323_v53 = vld [vmem:[%s1859_s3 + $0x8] sm:$0xff]  ;;  %v61_v55 = vld [vmem:[%s1856_s0 + $0xf8] sm:$0xff]  ;;  %v58_v57 = vld [vmem:[%s1856_s0 + $0xe0] sm:$0xff] }
  0x22   :  { %1007 = vmatmul.msk.f32.gmra.mxu1 %vm127_vm0, %v73_v34  ;;  %429 = vmatpush.msra.mxu3 %v343_v22  ;;  %v334_v34 = vld [vmem:[%s1859_s3 + $0x60] sm:$0xff] }
  0x23   :  { %365 = vmatpush.msra.mxu2 %v340_v24 }
  0x24   :  { %430 = vmatpush.msra.mxu3 %v341_v25 }
  0x25   :  { %366 = vmatpush.msra.mxu2 %v338_v26 }
  0x26   :  { %431 = vmatpush.msra.mxu3 %v339_v29 }
  0x27   :  { %367 = vmatpush.msra.mxu2 %v336_v30 }
  0x28   :  { %432 = vmatpush.msra.mxu3 %v337_v31 }
  0x29   :  { %195 = vmatmul.f32.gmra.mxu0 %v70_v36  ;;  %v95_v36 = vadd.f32 %v1257_v14, %v57_v33  ;;  %368 = vmatpush.msra.mxu2 %v334_v34 }
  0x2a   :  { %1008 = vmatmul.msk.f32.gmra.mxu1 %vm127_vm0, %v75_v38  ;;  %433 = vmatpush.msra.mxu3 %v335_v35  ;;  %v333_v38 = vld [vmem:[%s1859_s3 + $0x58] sm:$0xff] }
  0x2b   :  { %369 = vmatpush.msra.mxu2 %v332_v37 }
  0x2c   :  { %434 = vmatpush.msra.mxu3 %v333_v38 }
  0x2d   :  { %370 = vmatpush.msra.mxu2 %v330_v39 }
  0x2e   :  { %435 = vmatpush.msra.mxu3 %v331_v41 }
  0x30   :  { %436 = vmatpush.msra.mxu3 %v329_v45 }
  0x31   :  { %198 = vmatmul.f32.gmra.mxu0 %v72_v40  ;;  %v54_v40 = vld [vmem:[%s1856_s0 + $0xc0] sm:$0xff] }
  0x32   :  { %1009 = vmatmul.msk.f32.gmra.mxu1 %vm127_vm0, %v77_v42  ;;  %v92_v42 = vadd.f32 %v1295_v28, %v54_v40  ;;  %437 = vmatpush.msra.mxu3 %v327_v47 }
  0x39   :  { %201 = vmatmul.f32.gmra.mxu0 %v74_v44  ;;  %v328_v44 = vld [vmem:[%s1859_s3 + $0x30] sm:$0xff] }
  0x3a   :  { %1010 = vmatmul.msk.f32.gmra.mxu1 %vm127_vm0, %v79_v46  ;;  %371 = vmatpush.msra.mxu2 %v328_v44  ;;  %v326_v46 = vld [vmem:[%s1859_s3 + $0x20] sm:$0xff] }
  0x3c   :  { %372 = vmatpush.msra.mxu2 %v326_v46 }
  0x3e   :  { %373 = vmatpush.msra.mxu2 %v324_v49 }
  0x41   :  { %204 = vmatmul.f32.gmra.mxu0 %v76_v48  ;;  %v97_v48 = vadd.f32 %v1257_v14, %v59_v43 }
  0x42   :  { %1011 = vmatmul.msk.f32.gmra.mxu1 %vm127_vm0, %v81_v50  ;;  %v325_v50 = vld [vmem:[%s1859_s3 + $0x18] sm:$0xff] }
  0x43   :  { %438 = vmatpush.msra.mxu3 %v325_v50 }
  0x45   :  { %439 = vmatpush.msra.mxu3 %v323_v53 }
  0x49   :  { %207 = vmatmul.f32.gmra.mxu0 %v78_v52  ;;  %v322_v52 = vld [vmem:[%s1859_s3] sm:$0xff] }
  0x4a   :  { %1012 = vmatmul.msk.f32.gmra.mxu1 %vm127_vm0, %v83_v54  ;;  %374 = vmatpush.msra.mxu2 %v322_v52  ;;  %v94_v54 = vadd.f32 %v1295_v28, %v56_v51 }
  0x51   :  { %210 = vmatmul.f32.gmra.mxu0 %v80_v56  ;;  %v99_v56 = vadd.f32 %v1257_v14, %v61_v55  ;;  %v1537_v14 = vld [vmem:[%s1861_s5] ss:$0 sm:$0xff] }
  0x52   :  { %1013 = vmatmul.msk.f32.gmra.mxu1 %vm127_vm0, %v85_v58  ;;  %v96_v58 = vadd.f32 %v1295_v28, %v58_v57 }
  0x59   :  { %213 = vmatmul.f32.gmra.mxu0 %v82_v60  ;;  %v60_v60 = vld [vmem:[%s1856_s0 + $0xf0] sm:$0xff] }
  0x5a   :  { %1014 = vmatmul.msk.f32.gmra.mxu1 %vm127_vm0, %v87_v62  ;;  %v98_v61 = vadd.f32 %v1295_v28, %v60_v60 }
  0x61   :  { %216 = vmatmul.f32.gmra.mxu0 %v84_v0 }
  0x62   :  { %1015 = vmatmul.msk.f32.gmra.mxu1 %vm127_vm0, %v89_v2 }
  0x69   :  { %219 = vmatmul.f32.gmra.mxu0 %v86_v8 }
  0x6a   :  { %1016 = vmatmul.msk.f32.gmra.mxu1 %vm127_vm0, %v91_v10 }
  0x71   :  { %222 = vmatmul.f32.gmra.mxu0 %v88_v19 }
  0x72   :  { %1017 = vmatmul.msk.f32.gmra.mxu1 %vm127_vm0, %v93_v23 }
  0x79   :  { %225 = vmatmul.f32.gmra.mxu0 %v90_v32 }
  0x7a   :  { %1018 = vmatmul.msk.f32.gmra.mxu1 %vm127_vm0, %v95_v36 }
  0x81   :  { %228 = vmatmul.f32.gmra.mxu0 %v92_v42 }
  0x82   :  { %1019 = vmatmul.msk.f32.gmra.mxu1 %vm127_vm0, %v97_v48 }
  0x89   :  { %231 = vmatmul.f32.gmra.mxu0 %v94_v54 }
  0x8a   :  { %1020 = vmatmul.msk.f32.gmra.mxu1 %vm127_vm0, %v99_v56 }
  0x8f   :  { %v258_v59 = vpop.f32.mrf.mxu1 }
  0x91   :  { %234 = vmatmul.f32.gmra.mxu0 %v96_v58 }
  0x97   :  { %v261_v62 = vpop.f32.mrf.mxu1 }
  0x99   :  { %237 = vmatmul.f32.gmra.mxu0 %v98_v61 }
  0x9e   :  { %v193_v63 = vpop.f32.mrf.mxu0 }
  0x9f   :  { %v194_v0 = vadd.f32 %v1537_v14, %v193_v63  ;;  %v264_v2 = vpop.f32.mrf.mxu1 }
  0xa1   :  { %v259_v1 = vadd.f32 %v258_v59, %v194_v0 }
  0xa3   :  { %v1540_v3 = vmax.f32 %v259_v1, 0.0 }
  0xa5   :  { %375 = vmatmul.f32.vlgmr.msra.gmra.mxu2 %v1540_v3  ;;  %440 = vmatmul.f32.vlgmr.msra.gmra.mxu3 %v1540_v3 }
  0xa6   :  { %v196_v4 = vpop.f32.mrf.mxu0 }
  0xa7   :  { %v197_v28 = vadd.f32 %v1537_v14, %v196_v4  ;;  %v267_v6 = vpop.f32.mrf.mxu1 }
  0xa9   :  { %v262_v5 = vadd.f32 %v261_v62, %v197_v28 }
  0xab   :  { %v1545_v7 = vmax.f32 %v262_v5, 0.0 }
  0xad   :  { %378 = vmatmul.f32.gmra.mxu2 %v1545_v7  ;;  %443 = vmatmul.f32.gmra.mxu3 %v1545_v7 }
  0xae   :  { %v199_v8 = vpop.f32.mrf.mxu0 }
  0xaf   :  { %v200_v9 = vadd.f32 %v1537_v14, %v199_v8  ;;  %v270_v11 = vpop.f32.mrf.mxu1 }
  0xb1   :  { %v265_v10 = vadd.f32 %v264_v2, %v200_v9 }
  0xb3   :  { %v1550_v12 = vmax.f32 %v265_v10, 0.0 }
  0xb5   :  { %381 = vmatmul.f32.gmra.mxu2 %v1550_v12  ;;  %446 = vmatmul.f32.gmra.mxu3 %v1550_v12 }
  0xb6   :  { %v202_v13 = vpop.f32.mrf.mxu0 }
  0xb7   :  { %v203_v15 = vadd.f32 %v1537_v14, %v202_v13  ;;  %v273_v17 = vpop.f32.mrf.mxu1 }
  0xb9   :  { %v268_v16 = vadd.f32 %v267_v6, %v203_v15 }
  0xbb   :  { %v1555_v18 = vmax.f32 %v268_v16, 0.0 }
  0xbd   :  { %384 = vmatmul.f32.gmra.mxu2 %v1555_v18  ;;  %449 = vmatmul.f32.gmra.mxu3 %v1555_v18 }
  0xbe   :  { %v205_v19 = vpop.f32.mrf.mxu0 }
  0xbf   :  { %v206_v20 = vadd.f32 %v1537_v14, %v205_v19  ;;  %v276_v22 = vpop.f32.mrf.mxu1 }
  0xc1   :  { %v271_v21 = vadd.f32 %v270_v11, %v206_v20 }
  0xc3   :  { %v1560_v23 = vmax.f32 %v271_v21, 0.0 }
  0xc5   :  { %387 = vmatmul.f32.gmra.mxu2 %v1560_v23  ;;  %452 = vmatmul.f32.gmra.mxu3 %v1560_v23 }
  0xc6   :  { %v208_v24 = vpop.f32.mrf.mxu0 }
  0xc7   :  { %v209_v25 = vadd.f32 %v1537_v14, %v208_v24  ;;  %v279_v27 = vpop.f32.mrf.mxu1 }
  0xc9   :  { %v274_v26 = vadd.f32 %v273_v17, %v209_v25  ;;  %v27_v17 = vld [vmem:[%s1861_s5 + $0x1] sm:$0x3] }
  0xca   :  { %v1594_v19 = vperm.slane %v27_v17, 1 }
  0xcb   :  { %v1565_v29 = vmax.f32 %v274_v26, 0.0 }
  0xcd   :  { %390 = vmatmul.f32.gmra.mxu2 %v1565_v29  ;;  %455 = vmatmul.f32.gmra.mxu3 %v1565_v29 }
  0xce   :  { %v211_v30 = vpop.f32.mrf.mxu0 }
  0xcf   :  { %v212_v31 = vadd.f32 %v1537_v14, %v211_v30  ;;  %v282_v33 = vpop.f32.mrf.mxu1 }
  0xd1   :  { %v277_v32 = vadd.f32 %v276_v22, %v212_v31 }
  0xd3   :  { %v1570_v34 = vmax.f32 %v277_v32, 0.0  ;;  %v1604_v32 = vperm.slane %v27_v17, 0 }
  0xd5   :  { %393 = vmatmul.f32.gmra.mxu2 %v1570_v34  ;;  %458 = vmatmul.f32.gmra.mxu3 %v1570_v34 }
  0xd6   :  { %v214_v35 = vpop.f32.mrf.mxu0 }
  0xd7   :  { %v215_v36 = vadd.f32 %v1537_v14, %v214_v35  ;;  %v285_v38 = vpop.f32.mrf.mxu1 }
  0xd9   :  { %v280_v37 = vadd.f32 %v279_v27, %v215_v36 }
  0xdb   :  { %v1575_v39 = vmax.f32 %v280_v37, 0.0 }
  0xdd   :  { %396 = vmatmul.f32.gmra.mxu2 %v1575_v39  ;;  %461 = vmatmul.f32.gmra.mxu3 %v1575_v39 }
  0xde   :  { %v217_v40 = vpop.f32.mrf.mxu0 }
  0xdf   :  { %v218_v41 = vadd.f32 %v1537_v14, %v217_v40  ;;  %v288_v44 = vpop.f32.mrf.mxu1 }
  0xe1   :  { %v283_v42 = vadd.f32 %v282_v33, %v218_v41 }
  0xe3   :  { %v1580_v43 = vmax.f32 %v283_v42, 0.0 }
  0xe5   :  { %399 = vmatmul.f32.gmra.mxu2 %v1580_v43  ;;  %464 = vmatmul.f32.gmra.mxu3 %v1580_v43 }
  0xe6   :  { %v220_v45 = vpop.f32.mrf.mxu0 }
  0xe7   :  { %v221_v46 = vadd.f32 %v1537_v14, %v220_v45  ;;  %v291_v50 = vpop.f32.mrf.mxu1 }
  0xe9   :  { %v286_v47 = vadd.f32 %v285_v38, %v221_v46 }
  0xeb   :  { %v315_v48 = vmax.f32 %v286_v47, 0.0 }
  0xed   :  { %402 = vmatmul.f32.gmra.mxu2 %v315_v48  ;;  %467 = vmatmul.f32.gmra.mxu3 %v315_v48 }
  0xee   :  { %v223_v49 = vpop.f32.mrf.mxu0 }
  0xef   :  { %v224_v51 = vadd.f32 %v1537_v14, %v223_v49  ;;  %v294_v56 = vpop.f32.mrf.mxu1 }
  0xf1   :  { %v289_v52 = vadd.f32 %v288_v44, %v224_v51 }
  0xf3   :  { %v316_v53 = vmax.f32 %v289_v52, 0.0 }
  0xf5   :  { %405 = vmatmul.f32.gmra.mxu2 %v316_v53  ;;  %470 = vmatmul.f32.gmra.mxu3 %v316_v53 }
  0xf6   :  { %v226_v54 = vpop.f32.mrf.mxu0 }
  0xf7   :  { %v227_v55 = vadd.f32 %v1537_v14, %v226_v54  ;;  %v297_v62 = vpop.f32.mrf.mxu1 }
  0xf9   :  { %v292_v57 = vadd.f32 %v291_v50, %v227_v55 }
  0xfb   :  { %v317_v58 = vmax.f32 %v292_v57, 0.0 }
  0xfd   :  { %408 = vmatmul.f32.gmra.mxu2 %v317_v58  ;;  %473 = vmatmul.f32.gmra.mxu3 %v317_v58 }
  0xfe   :  { %v229_v59 = vpop.f32.mrf.mxu0 }
  0xff   :  { %v230_v60 = vadd.f32 %v1537_v14, %v229_v59  ;;  %v300_v28 = vpop.f32.mrf.mxu1 }
 0x101   :  { %v295_v61 = vadd.f32 %v294_v56, %v230_v60 }
 0x103   :  { %v318_v63 = vmax.f32 %v295_v61, 0.0 }
 0x105   :  { %411 = vmatmul.f32.gmra.mxu2 %v318_v63  ;;  %476 = vmatmul.f32.gmra.mxu3 %v318_v63 }
 0x106   :  { %v232_v0 = vpop.f32.mrf.mxu0 }
 0x107   :  { %v233_v1 = vadd.f32 %v1537_v14, %v232_v0  ;;  %v303_v11 = vpop.f32.mrf.mxu1 }
 0x109   :  { %v298_v2 = vadd.f32 %v297_v62, %v233_v1 }
 0x10b   :  { %v319_v4 = vmax.f32 %v298_v2, 0.0 }
 0x10d   :  { %414 = vmatmul.f32.gmra.mxu2 %v319_v4  ;;  %479 = vmatmul.f32.gmra.mxu3 %v319_v4 }
 0x10e   :  { %v235_v5 = vpop.f32.mrf.mxu0 }
 0x10f   :  { %v236_v6 = vadd.f32 %v1537_v14, %v235_v5 }
 0x111   :  { %v301_v8 = vadd.f32 %v300_v28, %v236_v6 }
 0x113   :  { %v320_v9 = vmax.f32 %v301_v8, 0.0 }
 0x115   :  { %417 = vmatmul.f32.gmra.mxu2 %v320_v9  ;;  %482 = vmatmul.f32.gmra.mxu3 %v320_v9 }
 0x116   :  { %v238_v10 = vpop.f32.mrf.mxu0 }
 0x117   :  { %v239_v13 = vadd.f32 %v1537_v14, %v238_v10 }
 0x119   :  { %v304_v15 = vadd.f32 %v303_v11, %v239_v13 }
 0x11b   :  { %v321_v16 = vmax.f32 %v304_v15, 0.0 }
 0x11d   :  { %420 = vmatmul.f32.gmra.mxu2 %v321_v16  ;;  %485 = vmatmul.f32.gmra.mxu3 %v321_v16 }
 0x11e   :  { %864 = vmatpush.msrb.mxu0 %v321_v16 }
 0x120   :  { %865 = vmatpush.msrb.mxu0 %v320_v9 }
 0x122   :  { %866 = vmatpush.msrb.mxu0 %v319_v4 }
 0x124   :  { %867 = vmatpush.msrb.mxu0 %v318_v63 }
 0x126   :  { %868 = vmatpush.msrb.mxu0 %v317_v58 }
 0x128   :  { %869 = vmatpush.msrb.mxu0 %v316_v53  ;;  %v376_v20 = vpop.f32.mrf.mxu2  ;;  %v441_v21 = vpop.f32.mrf.mxu3 }
 0x129   :  { %v442_v14 = vadd.f32 %v441_v21, %v1594_v19  ;;  %v377_v38 = vadd.f32 %v376_v20, %v1604_v32 }
 0x12a   :  { %870 = vmatpush.msrb.mxu0 %v315_v48 }
 0x12b   :  { %v1021_v22 = vmul.f32 -1.442695, %v442_v14 }
 0x12c   :  { %871 = vmatpush.msrb.mxu0 %v1580_v43 }
 0x12d   :  { %1042 = vpow2.f32 %v1021_v22 }
 0x12e   :  { %872 = vmatpush.msrb.mxu0 %v1575_v39 }
 0x130   :  { %873 = vmatpush.msrb.mxu0 %v1570_v34  ;;  %v379_v24 = vpop.f32.mrf.mxu2  ;;  %v444_v25 = vpop.f32.mrf.mxu3 }
 0x131   :  { %v445_v26 = vadd.f32 %v444_v25, %v1594_v19 }
 0x132   :  { %874 = vmatpush.msrb.mxu0 %v1565_v29 }
 0x133   :  { %v1043_v27 = vpop.eup %1042  ;;  %v1022_v30 = vmul.f32 -1.442695, %v445_v26 }
 0x134   :  { %v553_v31 = vadd.f32 1.0, %v1043_v27  ;;  %875 = vmatpush.msrb.mxu0 %v1560_v23 }
 0x135   :  { %1044 = vpow2.f32 %v1022_v30 }
 0x136   :  { %1046 = vrcp.f32 %v553_v31  ;;  %876 = vmatpush.msrb.mxu0 %v1555_v18  ;;  %v578_v43 = vand.u32 2147483647, %v553_v31  ;;  %vm574_vm2 = vweird.f32 %v553_v31 }
 0x138   :  { %877 = vmatpush.msrb.mxu0 %v1550_v12  ;;  %v382_v33 = vpop.f32.mrf.mxu2  ;;  %v447_v34 = vpop.f32.mrf.mxu3  ;;  %vm579_vm4 = vcmp.eq.f32.partialorder %v578_v43, 8.507059e+37 }
 0x139   :  { %v448_v35 = vadd.f32 %v447_v34, %v1594_v19  ;;  %v383_v2 = vadd.f32 %v382_v33, %v1604_v32 }
 0x13a   :  { %878 = vmatpush.msrb.mxu0 %v1545_v7  ;;  %v580_v7 = vand.u32 2147483648, %v553_v31 }
 0x13b   :  { %v1045_v29 = vpop.eup %1044  ;;  %v1023_v36 = vmul.f32 -1.442695, %v448_v35 }
 0x13c   :  { %v1047_v37 = vpop.eup %1046  ;;  %v554_v23 = vadd.f32 1.0, %v1045_v29  ;;  %879 = vmatpush.msrb.mxu0 %v1540_v3  ;;  %v380_v3 = vadd.f32 %v379_v24, %v1604_v32  ;;  %v581_v51 = vor.u32 1.1754944e-38, %v580_v7 }
 0x13d   :  { %1048 = vpow2.f32 %v1023_v36  ;;  %v570_v18 = vmul.f32 %v1047_v37, %v553_v31  ;;  %vm575_vm1 = vweird.f32 %v1047_v37 }
 0x13e   :  { %1050 = vrcp.f32 %v554_v23  ;;  %vm576_vm3 = vmor %vm574_vm2, %vm575_vm1  ;;  %v595_v60 = vand.u32 2147483648, %v554_v23  ;;  %v593_v61 = vand.u32 2147483647, %v554_v23  ;;  %vm589_vm6 = vweird.f32 %v554_v23 }
 0x13f   :  { %v571_v39 = vsub.f32 1.0, %v570_v18  ;;  %1052 = vtanh.f32 %v377_v38 }
 0x140   :  { %v1611_v12 = vpop.f32.mrf.mxu2  ;;  %v450_v40 = vpop.f32.mrf.mxu3  ;;  %v596_v6 = vor.u32 1.1754944e-38, %v595_v60  ;;  %vm594_vm8 = vcmp.eq.f32.partialorder %v593_v61, 8.507059e+37 }
 0x141   :  { %v451_v41 = vadd.f32 %v450_v40, %v1594_v19  ;;  %v572_v42 = vmul.f32 %v1047_v37, %v571_v39  ;;  %v386_v26 = vadd.f32 %v1611_v12, %v1604_v32 }
 0x143   :  { %v1049_v44 = vpop.eup %1048  ;;  %v1024_v45 = vmul.f32 -1.442695, %v451_v41  ;;  %v573_v46 = vadd.f32 %v1047_v37, %v572_v42 }
 0x144   :  { %v1051_v47 = vpop.eup %1050  ;;  %v555_v48 = vadd.f32 1.0, %v1049_v44 }
 0x145   :  { %1054 = vpow2.f32 %v1024_v45  ;;  %v585_v49 = vmul.f32 %v1051_v47, %v554_v23  ;;  %v577_v50 = vsel %vm576_vm3, %v1047_v37, %v573_v46  ;;  %v1053_v52 = vpop.eup %1052  ;;  %vm590_vm5 = vweird.f32 %v1051_v47 }
 0x146   :  { %1056 = vrcp.f32 %v555_v48  ;;  %v582_v54 = vsel %vm579_vm4, %v581_v51, %v577_v50  ;;  %vm591_vm7 = vmor %vm589_vm6, %vm590_vm5  ;;  %v610_v20 = vand.u32 2147483648, %v555_v48  ;;  %v608_v21 = vand.u32 2147483647, %v555_v48 }
 0x147   :  { %v586_v53 = vsub.f32 1.0, %v585_v49  ;;  %1058 = vtanh.f32 %v380_v3  ;;  %v1617_v57 = vmul.f32 %v1053_v52, %v582_v54  ;;  %vm604_vm10 = vweird.f32 %v555_v48 }
 0x148   :  { %v1615_v55 = vpop.f32.mrf.mxu2  ;;  %v453_v56 = vpop.f32.mrf.mxu3  ;;  %v611_v33 = vor.u32 1.1754944e-38, %v610_v20  ;;  %vm609_vm12 = vcmp.eq.f32.partialorder %v608_v21, 8.507059e+37 }
 0x149   :  { %v454_v58 = vadd.f32 %v453_v56, %v1594_v19  ;;  %v587_v59 = vmul.f32 %v1051_v47, %v586_v53  ;;  %v389_v43 = vadd.f32 %v1615_v55, %v1604_v32 }
 0x14b   :  { %v1055_v62 = vpop.eup %1054  ;;  %v1025_v63 = vmul.f32 -1.442695, %v454_v58  ;;  %v588_v0 = vadd.f32 %v1051_v47, %v587_v59 }
 0x14c   :  { %v1057_v1 = vpop.eup %1056  ;;  %v556_v4 = vadd.f32 1.0, %v1055_v62 }
 0x14d   :  { %1060 = vpow2.f32 %v1025_v63  ;;  %v600_v28 = vmul.f32 %v1057_v1, %v555_v48  ;;  %v592_v5 = vsel %vm591_vm7, %v1051_v47, %v588_v0  ;;  %v1059_v8 = vpop.eup %1058  ;;  %vm605_vm9 = vweird.f32 %v1057_v1 }
 0x14e   :  { %1062 = vrcp.f32 %v556_v4  ;;  %v597_v10 = vsel %vm594_vm8, %v596_v6, %v592_v5  ;;  %vm606_vm11 = vmor %vm604_vm10, %vm605_vm9  ;;  %v625_v39 = vand.u32 2147483648, %v556_v4  ;;  %v623_v12 = vand.u32 2147483647, %v556_v4 }
 0x14f   :  { %v601_v9 = vsub.f32 1.0, %v600_v28  ;;  %1064 = vtanh.f32 %v383_v2  ;;  %v1623_v15 = vmul.f32 %v1059_v8, %v597_v10  ;;  %vm619_vm14 = vweird.f32 %v556_v4 }
 0x150   :  { %v1621_v11 = vpop.f32.mrf.mxu2  ;;  %v456_v13 = vpop.f32.mrf.mxu3  ;;  %v626_v47 = vor.u32 1.1754944e-38, %v625_v39  ;;  %vm624_vm0 = vcmp.eq.f32.partialorder %v623_v12, 8.507059e+37 }
 0x151   :  { %v457_v16 = vadd.f32 %v456_v13, %v1594_v19  ;;  %v602_v17 = vmul.f32 %v1057_v1, %v601_v9  ;;  %v392_v62 = vadd.f32 %v1621_v11, %v1604_v32 }
 0x153   :  { %v1061_v14 = vpop.eup %1060  ;;  %v1026_v22 = vmul.f32 -1.442695, %v457_v16  ;;  %v603_v24 = vadd.f32 %v1057_v1, %v602_v17 }
 0x154   :  { %v1063_v25 = vpop.eup %1062  ;;  %v557_v27 = vadd.f32 1.0, %v1061_v14 }
 0x155   :  { %1066 = vpow2.f32 %v1026_v22  ;;  %v615_v30 = vmul.f32 %v1063_v25, %v556_v4  ;;  %v607_v31 = vsel %vm606_vm11, %v1057_v1, %v603_v24  ;;  %v1065_v34 = vpop.eup %1064  ;;  %vm620_vm13 = vweird.f32 %v1063_v25 }
 0x156   :  { %1068 = vrcp.f32 %v557_v27  ;;  %v612_v29 = vsel %vm609_vm12, %v611_v33, %v607_v31  ;;  %vm621_vm15 = vmor %vm619_vm14, %vm620_vm13  ;;  %v640_v55 = vand.u32 2147483648, %v557_v27  ;;  %v638_v56 = vand.u32 2147483647, %v557_v27 }
 0x157   :  { %v616_v35 = vsub.f32 1.0, %v615_v30  ;;  %1070 = vtanh.f32 %v386_v26  ;;  %v1630_v38 = vmul.f32 %v1065_v34, %v612_v29  ;;  %vm634_vm2 = vweird.f32 %v557_v27 }
 0x158   :  { %v1628_v36 = vpop.f32.mrf.mxu2  ;;  %v459_v37 = vpop.f32.mrf.mxu3  ;;  %v641_v2 = vor.u32 1.1754944e-38, %v640_v55  ;;  %vm639_vm4 = vcmp.eq.f32.partialorder %v638_v56, 8.507059e+37 }
 0x159   :  { %v460_v23 = vadd.f32 %v459_v37, %v1594_v19  ;;  %v617_v18 = vmul.f32 %v1063_v25, %v616_v35  ;;  %v395_v22 = vadd.f32 %v1628_v36, %v1604_v32 }
 0x15b   :  { %v1067_v40 = vpop.eup %1066  ;;  %v1027_v41 = vmul.f32 -1.442695, %v460_v23  ;;  %v618_v42 = vadd.f32 %v1063_v25, %v617_v18 }
 0x15c   :  { %v1069_v7 = vpop.eup %1068  ;;  %v558_v44 = vadd.f32 1.0, %v1067_v40 }
 0x15d   :  { %1072 = vpow2.f32 %v1027_v41  ;;  %v630_v45 = vmul.f32 %v1069_v7, %v557_v27  ;;  %v622_v46 = vsel %vm621_vm15, %v1063_v25, %v618_v42  ;;  %v1071_v3 = vpop.eup %1070  ;;  %vm635_vm1 = vweird.f32 %v1069_v7 }
 0x15e   :  { %1074 = vrcp.f32 %v558_v44  ;;  %v627_v49 = vsel %vm624_vm0, %v626_v47, %v622_v46  ;;  %vm636_vm3 = vmor %vm634_vm2, %vm635_vm1  ;;  %v655_v11 = vand.u32 2147483648, %v558_v44  ;;  %v653_v13 = vand.u32 2147483647, %v558_v44 }
 0x15f   :  { %v631_v48 = vsub.f32 1.0, %v630_v45  ;;  %1076 = vtanh.f32 %v389_v43  ;;  %v1635_v51 = vmul.f32 %v1071_v3, %v627_v49  ;;  %vm649_vm6 = vweird.f32 %v558_v44 }
 0x160   :  { %v462_v50 = vpop.f32.mrf.mxu3  ;;  %v397_v52 = vpop.f32.mrf.mxu2  ;;  %v656_v27 = vor.u32 1.1754944e-38, %v655_v11  ;;  %vm654_vm8 = vcmp.eq.f32.partialorder %v653_v13, 8.507059e+37 }
 0x161   :  { %v463_v53 = vadd.f32 %v462_v50, %v1594_v19  ;;  %v632_v54 = vmul.f32 %v1069_v7, %v631_v48  ;;  %v398_v41 = vadd.f32 %v397_v52, %v1604_v32 }
 0x163   :  { %v1073_v58 = vpop.eup %1072  ;;  %v1028_v59 = vmul.f32 -1.442695, %v463_v53  ;;  %v633_v60 = vadd.f32 %v1069_v7, %v632_v54 }
 0x164   :  { %v1075_v61 = vpop.eup %1074  ;;  %v559_v63 = vadd.f32 1.0, %v1073_v58 }
 0x165   :  { %1078 = vpow2.f32 %v1028_v59  ;;  %v645_v0 = vmul.f32 %v1075_v61, %v558_v44  ;;  %v637_v1 = vsel %vm636_vm3, %v1069_v7, %v633_v60  ;;  %v1077_v4 = vpop.eup %1076  ;;  %vm650_vm5 = vweird.f32 %v1075_v61 }
 0x166   :  { %1080 = vrcp.f32 %v559_v63  ;;  %v642_v5 = vsel %vm639_vm4, %v641_v2, %v637_v1  ;;  %vm651_vm7 = vmor %vm649_vm6, %vm650_vm5  ;;  %v670_v36 = vand.u32 2147483648, %v559_v63  ;;  %v668_v23 = vand.u32 2147483647, %v559_v63 }
 0x167   :  { %v646_v28 = vsub.f32 1.0, %v645_v0  ;;  %1082 = vtanh.f32 %v392_v62  ;;  %v1640_v8 = vmul.f32 %v1077_v4, %v642_v5  ;;  %vm664_vm10 = vweird.f32 %v559_v63 }
 0x168   :  { %v465_v6 = vpop.f32.mrf.mxu3  ;;  %v400_v17 = vpop.f32.mrf.mxu2  ;;  %v671_v45 = vor.u32 1.1754944e-38, %v670_v36  ;;  %vm669_vm12 = vcmp.eq.f32.partialorder %v668_v23, 8.507059e+37 }
 0x169   :  { %v466_v9 = vadd.f32 %v465_v6, %v1594_v19  ;;  %v647_v10 = vmul.f32 %v1075_v61, %v646_v28  ;;  %v401_v59 = vadd.f32 %v400_v17, %v1604_v32 }
 0x16b   :  { %v1079_v16 = vpop.eup %1078  ;;  %v1029_v20 = vmul.f32 -1.442695, %v466_v9  ;;  %v648_v21 = vadd.f32 %v1075_v61, %v647_v10 }
 0x16c   :  { %v1081_v14 = vpop.eup %1080  ;;  %v560_v24 = vadd.f32 1.0, %v1079_v16 }
 0x16d   :  { %1084 = vpow2.f32 %v1029_v20  ;;  %v660_v25 = vmul.f32 %v1081_v14, %v559_v63  ;;  %v652_v26 = vsel %vm651_vm7, %v1075_v61, %v648_v21  ;;  %v1083_v30 = vpop.eup %1082  ;;  %vm665_vm9 = vweird.f32 %v1081_v14 }
 0x16e   :  { %1086 = vrcp.f32 %v560_v24  ;;  %v657_v33 = vsel %vm654_vm8, %v656_v27, %v652_v26  ;;  %vm666_vm11 = vmor %vm664_vm10, %vm665_vm9  ;;  %v685_v52 = vand.u32 2147483648, %v560_v24  ;;  %v683_v53 = vand.u32 2147483647, %v560_v24 }
 0x16f   :  { %v661_v31 = vsub.f32 1.0, %v660_v25  ;;  %1088 = vtanh.f32 %v395_v22  ;;  %v1645_v35 = vmul.f32 %v1083_v30, %v657_v33  ;;  %vm679_vm14 = vweird.f32 %v560_v24 }
 0x170   :  { %v468_v34 = vpop.f32.mrf.mxu3  ;;  %v403_v7 = vpop.f32.mrf.mxu2  ;;  %v686_v62 = vor.u32 1.1754944e-38, %v685_v52  ;;  %vm684_vm0 = vcmp.eq.f32.partialorder %v683_v53, 8.507059e+37 }
 0x171   :  { %v469_v29 = vadd.f32 %v468_v34, %v1594_v19  ;;  %v662_v37 = vmul.f32 %v1081_v14, %v661_v31  ;;  %v404_v13 = vadd.f32 %v403_v7, %v1604_v32 }
 0x173   :  { %v1085_v18 = vpop.eup %1084  ;;  %v1030_v39 = vmul.f32 -1.442695, %v469_v29  ;;  %v663_v12 = vadd.f32 %v1081_v14, %v662_v37 }
 0x174   :  { %v1087_v40 = vpop.eup %1086  ;;  %v561_v42 = vadd.f32 1.0, %v1085_v18 }
 0x175   :  { %1090 = vpow2.f32 %v1030_v39  ;;  %v675_v43 = vmul.f32 %v1087_v40, %v560_v24  ;;  %v667_v44 = vsel %vm666_vm11, %v1081_v14, %v663_v12  ;;  %v1089_v46 = vpop.eup %1088  ;;  %vm680_vm13 = vweird.f32 %v1087_v40 }
 0x176   :  { %1092 = vrcp.f32 %v561_v42  ;;  %v672_v3 = vsel %vm669_vm12, %v671_v45, %v667_v44  ;;  %vm681_vm15 = vmor %vm679_vm14, %vm680_vm13  ;;  %v700_v6 = vand.u32 2147483648, %v561_v42  ;;  %v698_v9 = vand.u32 2147483647, %v561_v42 }
 0x177   :  { %v676_v47 = vsub.f32 1.0, %v675_v43  ;;  %v1651_v49 = vmul.f32 %v1089_v46, %v672_v3  ;;  %1094 = vtanh.f32 %v398_v41  ;;  %vm694_vm2 = vweird.f32 %v561_v42 }
 0x178   :  { %v1649_v48 = vpop.f32.mrf.mxu3  ;;  %v1654_v0 = vpop.f32.mrf.mxu2  ;;  %v701_v20 = vor.u32 1.1754944e-38, %v700_v6  ;;  %vm699_vm4 = vcmp.eq.f32.partialorder %v698_v9, 8.507059e+37 }
 0x179   :  { %v677_v50 = vmul.f32 %v1087_v40, %v676_v47  ;;  %v472_v46 = vadd.f32 %v1649_v48, %v1594_v19 }
 0x17b   :  { %v1091_v54 = vpop.eup %1090  ;;  %v678_v55 = vadd.f32 %v1087_v40, %v677_v50  ;;  %v1031_v52 = vmul.f32 -1.442695, %v472_v46 }
 0x17c   :  { %v1093_v56 = vpop.eup %1092  ;;  %v562_v58 = vadd.f32 1.0, %v1091_v54 }
 0x17d   :  { %v690_v60 = vmul.f32 %v1093_v56, %v561_v42  ;;  %v682_v61 = vsel %vm681_vm15, %v1087_v40, %v678_v55  ;;  %v1095_v63 = vpop.eup %1094  ;;  %vm695_vm1 = vweird.f32 %v1093_v56 }
 0x17e   :  { %1096 = vrcp.f32 %v562_v58  ;;  %v687_v2 = vsel %vm684_vm0, %v686_v62, %v682_v61  ;;  %vm696_vm3 = vmor %vm694_vm2, %vm695_vm1  ;;  %v715_v30 = vand.u32 2147483648, %v562_v58  ;;  %v713_v31 = vand.u32 2147483647, %v562_v58 }
 0x17f   :  { %v691_v1 = vsub.f32 1.0, %v690_v60  ;;  %v1656_v28 = vmul.f32 %v1095_v63, %v687_v2  ;;  %1098 = vtanh.f32 %v401_v59  ;;  %vm709_vm6 = vweird.f32 %v562_v58 }
 0x180   :  { %v474_v4 = vpop.f32.mrf.mxu3  ;;  %1100 = vtanh.f32 %v404_v13  ;;  %v1661_v26 = vpop.f32.mrf.mxu2  ;;  %v716_v29 = vor.u32 1.1754944e-38, %v715_v30  ;;  %vm714_vm8 = vcmp.eq.f32.partialorder %v713_v31, 8.507059e+37 }
 0x181   :  { %v692_v5 = vmul.f32 %v1093_v56, %v691_v1  ;;  %v475_v42 = vadd.f32 %v474_v4, %v1594_v19 }
 0x183   :  { %v693_v10 = vadd.f32 %v1093_v56, %v692_v5  ;;  %v1032_v47 = vmul.f32 -1.442695, %v475_v42 }
 0x184   :  { %v1097_v11 = vpop.eup %1096 }
 0x185   :  { %v705_v16 = vmul.f32 %v1097_v11, %v562_v58  ;;  %v697_v17 = vsel %vm696_vm3, %v1093_v56, %v693_v10  ;;  %v1099_v21 = vpop.eup %1098  ;;  %vm710_vm5 = vweird.f32 %v1097_v11 }
 0x186   :  { %v702_v22 = vsel %vm699_vm4, %v701_v20, %v697_v17  ;;  %vm711_vm7 = vmor %vm709_vm6, %vm710_vm5  ;;  %v1101_v37 = vpop.eup %1100 }
 0x187   :  { %v706_v14 = vsub.f32 1.0, %v705_v16  ;;  %v1659_v25 = vmul.f32 %v1099_v21, %v702_v22 }
 0x188   :  { %v477_v24 = vpop.f32.mrf.mxu3  ;;  %v1666_v12 = vpop.f32.mrf.mxu2 }
 0x189   :  { %v707_v27 = vmul.f32 %v1097_v11, %v706_v14  ;;  %v478_v40 = vadd.f32 %v477_v24, %v1594_v19 }
 0x18b   :  { %v708_v33 = vadd.f32 %v1097_v11, %v707_v27  ;;  %v1033_v7 = vmul.f32 -1.442695, %v478_v40 }
 0x18d   :  { %v712_v34 = vsel %vm711_vm7, %v1097_v11, %v708_v33 }
 0x18e   :  { %v717_v36 = vsel %vm714_vm8, %v716_v29, %v712_v34 }
 0x18f   :  { %v1663_v18 = vmul.f32 %v1101_v37, %v717_v36 }
 0x190   :  { %v480_v23 = vpop.f32.mrf.mxu3  ;;  %v415_v3 = vpop.f32.mrf.mxu2 }
 0x191   :  { %v481_v39 = vadd.f32 %v480_v23, %v1594_v19 }
 0x193   :  { %v1034_v41 = vmul.f32 -1.442695, %v481_v39 }
 0x195   :  { %1102 = vpow2.f32 %v1034_v41  ;;  %v416_v41 = vadd.f32 %v415_v3, %v1604_v32 }
 0x196   :  { %1104 = vpow2.f32 %v1033_v7 }
 0x198   :  { %v483_v43 = vpop.f32.mrf.mxu3  ;;  %v418_v62 = vpop.f32.mrf.mxu2 }
 0x199   :  { %v484_v44 = vadd.f32 %v483_v43, %v1594_v19  ;;  %v419_v31 = vadd.f32 %v418_v62, %v1604_v32  ;;  %v413_v62 = vadd.f32 %v1666_v12, %v1604_v32 }
 0x19b   :  { %v1035_v45 = vmul.f32 -1.442695, %v484_v44  ;;  %v1103_v50 = vpop.eup %1102 }
 0x19c   :  { %v1105_v55 = vpop.eup %1104  ;;  %v1674_v58 = vadd.f32 1.0, %v1103_v50 }
 0x19d   :  { %1106 = vpow2.f32 %v1035_v45  ;;  %v1678_v61 = vadd.f32 1.0, %v1105_v55 }
 0x19e   :  { %1108 = vpow2.f32 %v1032_v47  ;;  %vm769_vm2 = vweird.f32 %v1674_v58 }
 0x19f   :  { %1110 = vpow2.f32 %v1031_v52  ;;  %vm754_vm6 = vweird.f32 %v1678_v61 }
 0x1a0   :  { %v486_v53 = vpop.f32.mrf.mxu3  ;;  %v421_v13 = vpop.f32.mrf.mxu2 }
 0x1a1   :  { %v487_v54 = vadd.f32 %v486_v53, %v1594_v19  ;;  %v422_v14 = vadd.f32 %v421_v13, %v1604_v32  ;;  %v760_v13 = vand.u32 2147483648, %v1678_v61 }
 0x1a3   :  { %v1107_v56 = vpop.eup %1106  ;;  %v1036_v59 = vmul.f32 -1.442695, %v487_v54 }
 0x1a4   :  { %v1676_v60 = vadd.f32 1.0, %v1107_v56  ;;  %v1109_v48 = vpop.eup %1108 }
 0x1a5   :  { %1112 = vpow2.f32 %v1036_v59  ;;  %v1682_v63 = vadd.f32 1.0, %v1109_v48  ;;  %v1111_v19 = vpop.eup %1110  ;;  %v775_v59 = vand.u32 2147483648, %v1674_v58  ;;  %v773_v48 = vand.u32 2147483647, %v1674_v58 }
 0x1a6   :  { %1114 = vrcp.f32 %v1676_v60  ;;  %v1687_v6 = vadd.f32 1.0, %v1111_v19  ;;  %vm784_vm11 = vweird.f32 %v1676_v60  ;;  %v790_v42 = vand.u32 2147483648, %v1676_v60 }
 0x1a7   :  { %1116 = vrcp.f32 %v1674_v58  ;;  %v788_v45 = vand.u32 2147483647, %v1676_v60  ;;  %vm774_vm5 = vcmp.eq.f32.partialorder %v773_v48, 8.507059e+37  ;;  %v889_v48 = vld [vmem:[%s1860_s4 + $0x28] sm:$0xff] }
 0x1a8   :  { %1118 = vrcp.f32 %v1678_v61  ;;  %v791_v56 = vor.u32 1.1754944e-38, %v790_v42 }
 0x1a9   :  { %1120 = vrcp.f32 %v1682_v63  ;;  %vm789_vm1 = vcmp.eq.f32.partialorder %v788_v45, 8.507059e+37 }
 0x1ab   :  { %v1113_v1 = vpop.eup %1112 }
 0x1ac   :  { %v1115_v2 = vpop.eup %1114  ;;  %v568_v4 = vadd.f32 1.0, %v1113_v1  ;;  %v887_v1 = vld [vmem:[%s1860_s4 + $0x18] sm:$0xff] }
 0x1ad   :  { %v1685_v5 = vpop.eup %1116  ;;  %v780_v9 = vmul.f32 %v1115_v2, %v1676_v60  ;;  %vm785_vm9 = vweird.f32 %v1115_v2 }
 0x1ae   :  { %1122 = vrcp.f32 %v568_v4  ;;  %v1691_v10 = vpop.eup %1118  ;;  %v765_v11 = vmul.f32 %v1685_v5, %v1674_v58  ;;  %v805_v37 = vand.u32 2147483648, %v568_v4  ;;  %v803_v39 = vand.u32 2147483647, %v568_v4  ;;  %vm1712_vm13 = vmor %vm784_vm11, %vm785_vm9 }
 0x1af   :  { %1124 = vrcp.f32 %v1687_v6  ;;  %v781_v16 = vsub.f32 1.0, %v780_v9  ;;  %v1696_v17 = vpop.eup %1120  ;;  %v750_v20 = vmul.f32 %v1691_v10, %v1678_v61  ;;  %vm799_vm12 = vweird.f32 %v568_v4 }
 0x1b0   :  { %v766_v22 = vsub.f32 1.0, %v765_v11  ;;  %v735_v29 = vmul.f32 %v1696_v17, %v1682_v63  ;;  %1126 = vtanh.f32 %v422_v14  ;;  %v806_v47 = vor.u32 1.1754944e-38, %v805_v37 }
 0x1b1   :  { %v782_v27 = vmul.f32 %v1115_v2, %v781_v16  ;;  %v751_v34 = vsub.f32 1.0, %v750_v20  ;;  %1128 = vtanh.f32 %v419_v31  ;;  %vm770_vm15 = vweird.f32 %v1685_v5 }
 0x1b2   :  { %v767_v36 = vmul.f32 %v1685_v5, %v766_v22  ;;  %v736_v46 = vsub.f32 1.0, %v735_v29  ;;  %vm804_vm0 = vcmp.eq.f32.partialorder %v803_v39, 8.507059e+37  ;;  %1130 = vtanh.f32 %v416_v41  ;;  %vm1729_vm3 = vmor %vm769_vm2, %vm770_vm15 }
 0x1b3   :  { %v783_v40 = vadd.f32 %v1115_v2, %v782_v27  ;;  %v752_v3 = vmul.f32 %v1691_v10, %v751_v34  ;;  %vm755_vm4 = vweird.f32 %v1691_v10  ;;  %v776_v11 = vor.u32 1.1754944e-38, %v775_v59  ;;  %v891_v59 = vld [vmem:[%s1860_s4 + $0x38] sm:$0xff] }
 0x1b4   :  { %v1123_v21 = vpop.eup %1122  ;;  %v768_v53 = vadd.f32 %v1685_v5, %v767_v36  ;;  %v737_v12 = vmul.f32 %v1696_v17, %v736_v46  ;;  %v758_v20 = vand.u32 2147483647, %v1678_v61  ;;  %1132 = vtanh.f32 %v413_v62  ;;  %vm1744_vm7 = vmor %vm754_vm6, %vm755_vm4  ;;  %v888_v62 = vld [vmem:[%s1860_s4 + $0x20] sm:$0xff] }
 0x1b5   :  { %v795_v24 = vmul.f32 %v1123_v21, %v568_v4  ;;  %v1701_v30 = vpop.eup %1124  ;;  %vm800_vm10 = vweird.f32 %v1123_v21  ;;  %v787_v52 = vsel %vm1712_vm13, %v1115_v2, %v783_v40  ;;  %v753_v9 = vadd.f32 %v1691_v10, %v752_v3  ;;  %v898_v3 = vld [vmem:[%s1860_s4 + $0x70] sm:$0xff] }
 0x1b6   :  { %v720_v7 = vmul.f32 %v1701_v30, %v1687_v6  ;;  %vm801_vm14 = vmor %vm799_vm12, %vm800_vm10  ;;  %v1127_v54 = vpop.eup %1126  ;;  %v792_v19 = vsel %vm789_vm1, %v791_v56, %v787_v52  ;;  %v772_v4 = vsel %vm1729_vm3, %v1685_v5, %v768_v53  ;;  %vm740_vm8 = vweird.f32 %v1696_v17  ;;  %v896_v52 = vld [vmem:[%s1860_s4 + $0x60] sm:$0xff]  ;;  %v895_v53 = vld [vmem:[%s1860_s4 + $0x58] sm:$0xff] }
 0x1b7   :  { %v796_v33 = vsub.f32 1.0, %v795_v24  ;;  %v1129_v58 = vpop.eup %1128  ;;  %v777_v5 = vsel %vm774_vm5, %v776_v11, %v772_v4  ;;  %v757_v22 = vsel %vm1744_vm7, %v1691_v10, %v753_v9  ;;  %v738_v24 = vadd.f32 %v1696_v17, %v737_v12  ;;  %v892_v56 = vld [vmem:[%s1860_s4 + $0x40] sm:$0xff]  ;;  %v885_v4 = vld [vmem:[%s1860_s4 + $0x8] sm:$0xff] }
 0x1b8   :  { %v721_v2 = vsub.f32 1.0, %v720_v7  ;;  %v823_v16 = vmul.f32 %v1129_v58, %v792_v19  ;;  %v1131_v27 = vpop.eup %1130  ;;  %v761_v31 = vor.u32 1.1754944e-38, %v760_v13  ;;  %vm759_vm9 = vcmp.eq.f32.partialorder %v758_v20, 8.507059e+37  ;;  %v884_v58 = vld [vmem:[%s1860_s4] sm:$0xff] }
 0x1b9   :  { %v797_v23 = vmul.f32 %v1123_v21, %v796_v33  ;;  %v822_v33 = vmul.f32 %v1131_v27, %v777_v5  ;;  %vm739_vm10 = vweird.f32 %v1682_v63  ;;  %v743_v34 = vand.u32 2147483647, %v1682_v63 }
 0x1ba   :  { %v722_v61 = vmul.f32 %v1701_v30, %v721_v2  ;;  %v407_v29 = vadd.f32 %v1654_v0, %v1604_v32  ;;  %v762_v10 = vsel %vm759_vm9, %v761_v31, %v757_v22  ;;  %vm741_vm11 = vmor %vm739_vm10, %vm740_vm8  ;;  %vm725_vm12 = vweird.f32 %v1701_v30  ;;  %v886_v2 = vld [vmem:[%s1860_s4 + $0x10] sm:$0xff] }
 0x1bb   :  { %v798_v43 = vadd.f32 %v1123_v21, %v797_v23  ;;  %v742_v37 = vsel %vm741_vm11, %v1696_v17, %v738_v24  ;;  %v1133_v23 = vpop.eup %1132  ;;  %v730_v40 = vand.u32 2147483648, %v1687_v6  ;;  %vm744_vm13 = vcmp.eq.f32.partialorder %v743_v34, 8.507059e+37 }
 0x1bc   :  { %v723_v36 = vadd.f32 %v1701_v30, %v722_v61  ;;  %v821_v41 = vmul.f32 %v1133_v23, %v762_v10  ;;  %vm852_vm1 = vcmask 1040384   ;;  %v945_v11 = vlaneseq }
 0x1bd   :  { %v802_v50 = vsel %vm801_vm14, %v1123_v21, %v798_v43  ;;  %v410_v21 = vadd.f32 %v1661_v26, %v1604_v32  ;;  %v745_v26 = vand.u32 2147483648, %v1682_v63  ;;  %vm724_vm14 = vweird.f32 %v1687_v6 }
 0x1be   :  { %v807_v55 = vsel %vm804_vm0, %v806_v47, %v802_v50  ;;  %v728_v32 = vand.u32 2147483647, %v1687_v6  ;;  %vm726_vm15 = vmor %vm724_vm14, %vm725_vm12  ;;  %v731_v42 = vor.u32 1.1754944e-38, %v730_v40  ;;  %v1771_v6 = vld [vmem:[%s1861_s5 + $0x4] sm:$0x1]  ;;  %v897_v50 = vld [vmem:[%s1860_s4 + $0x68] sm:$0xff] }
 0x1bf   :  { %v824_v60 = vmul.f32 %v1127_v54, %v807_v55  ;;  %1134 = vtanh.f32 %v410_v21  ;;  %v746_v39 = vor.u32 1.1754944e-38, %v745_v26  ;;  %v727_v63 = vsel %vm726_vm15, %v1701_v30, %v723_v36  ;;  %v894_v54 = vld [vmem:[%s1860_s4 + $0x50] sm:$0xff]  ;;  %v893_v55 = vld [vmem:[%s1860_s4 + $0x48] sm:$0xff] }
 0x1c0   :  { %1136 = vtanh.f32 %v407_v29  ;;  %vm729_vm0 = vcmp.eq.f32.partialorder %v728_v32, 8.507059e+37  ;;  %v1172_v30 = vmov 2   ;;  %vm966_vm2 = vcmp.lt.s32.totalorder %v945_v11, 128 }
 0x1c1   :  { %831 = vmatpush.xpose.msrb.mxu1 %v824_v60  ;;  %v747_v0 = vsel %vm744_vm13, %v746_v39, %v742_v37  ;;  %v732_v43 = vsel %vm729_vm0, %v731_v42, %v727_v63  ;;  %1040 = vset.pattern.permute.xlu0 %v1172_v30  ;;  %v890_v60 = vld [vmem:[%s1860_s4 + $0x30] sm:$0xff]  ;;  %vm920_vm3 = vcmask 8192   ;;  %vm969_vm4 = vcmp.lt.s32.totalorder %v945_v11, 2 }
 0x1c2   :  { %827 = vperm.xlu0 %1040, %v1771_v6   ;;  %v946_v24 = vand.u32 127, %v945_v11  ;;  %vm976_vm11 = vcmp.ge.s32.totalorder %v945_v11, 2  ;;  %vm977_vm12 = vcmp.lt.s32.totalorder %v945_v11, 4  ;;  %vm981_vm14 = vcmp.ge.s32.totalorder %v945_v11, 4 }
 0x1c3   :  { %vm978_vm13 = vmand %vm976_vm11, %vm977_vm12  ;;  %vm982_vm15 = vcmp.lt.s32.totalorder %v945_v11, 5 }
 0x1c4   :  { %vm983_vm0 = vmand %vm981_vm14, %vm982_vm15 }
 0x1c5   :  { %832 = vmatpush.xpose.msrb.mxu1 %v823_v16  ;;  %v1135_v17 = vpop.eup %1134 }
 0x1c6   :  { %v820_v7 = vmul.f32 %v1135_v17, %v747_v0  ;;  %v1137_v44 = vpop.eup %1136 }
 0x1c7   :  { %v819_v45 = vmul.f32 %v1137_v44, %v732_v43 }
 0x1c9   :  { %833 = vmatpush.xpose.msrb.mxu1 %v822_v33 }
 0x1cd   :  { %834 = vmatpush.xpose.msrb.mxu1 %v821_v41 }
 0x1d1   :  { %835 = vmatpush.xpose.msrb.mxu1 %v820_v7 }
 0x1d5   :  { %836 = vmatpush.xpose.msrb.mxu1 %v819_v45 }
 0x1d9   :  { %837 = vmatpush.xpose.msrb.mxu1 %v1663_v18 }
 0x1dd   :  { %838 = vmatpush.xpose.msrb.mxu1 %v1659_v25 }
 0x1e1   :  { %839 = vmatpush.xpose.msrb.mxu1 %v1656_v28  ;;  %v28_v28 = vld [vmem:[%s1861_s5 + $0x3] sm:$0x1] }
 0x1e5   :  { %840 = vmatpush.xpose.msrb.mxu1 %v1651_v49 }
 0x1e9   :  { %841 = vmatpush.xpose.msrb.mxu1 %v1645_v35 }
 0x1ed   :  { %842 = vmatpush.xpose.msrb.mxu1 %v1640_v8 }
 0x1f1   :  { %843 = vmatpush.xpose.msrb.mxu1 %v1635_v51 }
 0x1f5   :  { %844 = vmatpush.xpose.msrb.mxu1 %v1630_v38 }
 0x1f9   :  { %845 = vmatpush.xpose.msrb.mxu1 %v1623_v15 }
 0x1fd   :  { %846 = vmatpush.xpose.msrb.mxu1 %v1617_v57  ;;  %v899_v57 = vld [vmem:[%s1860_s4 + $0x78] sm:$0xff]  ;;  %s1173_s4 = smov [#allocation2]  }
 0x1fe   :  { %900 = vmatpush.msrb.mxu2 %v899_v57  ;;  %s990_s18 = sshll.u32 %s1173_s4, 4  ;;  %s991_s18 = int_to_ptr.vmem [resolvable:$true] %s990_s18 }
 0x200   :  { %847 = vmatmul.f32.vlgmr.msrb.gmra.mxu1 %v28_v28  ;;  %901 = vmatpush.msrb.mxu2 %v898_v3 }
 0x202   :  { %902 = vmatpush.msrb.mxu2 %v897_v50 }
 0x204   :  { %903 = vmatpush.msrb.mxu2 %v896_v52 }
 0x206   :  { %904 = vmatpush.msrb.mxu2 %v895_v53 }
 0x208   :  { %905 = vmatpush.msrb.mxu2 %v894_v54 }
 0x20a   :  { %906 = vmatpush.msrb.mxu2 %v893_v55 }
 0x20c   :  { %907 = vmatpush.msrb.mxu2 %v892_v56 }
 0x20e   :  { %908 = vmatpush.msrb.mxu2 %v891_v59 }
 0x210   :  { %909 = vmatpush.msrb.mxu2 %v890_v60 }
 0x212   :  { %910 = vmatpush.msrb.mxu2 %v889_v48 }
 0x214   :  { %911 = vmatpush.msrb.mxu2 %v888_v62 }
 0x216   :  { %912 = vmatpush.msrb.mxu2 %v887_v1 }
 0x218   :  { %913 = vmatpush.msrb.mxu2 %v886_v2 }
 0x21a   :  { %914 = vmatpush.msrb.mxu2 %v885_v4 }
 0x21c   :  { %915 = vmatpush.msrb.mxu2 %v884_v58 }
 0x234   :  { %v828_v25 = vpop.permute.xlu0 %827 }
 0x235   :  { %v830_v18 = vperm.slane %v828_v25, 0 }
 0x27d   :  { %v848_v49 = vpop.f32.mrf.mxu1 }
 0x27e   :  { %v849_v35 = vadd.f32 %v848_v49, %v830_v18 }
 0x280   :  { %851 = vst [vmem:[#allocation2] sm:$0x1] %v849_v35  ;;  %v853_v8 = vsel %vm852_vm1, %v849_v35, -inf }
 0x281   :  { %854 = vmax.xlane.f32.xlu0 %v853_v8  ;;  %995 = dma.vmem_to_hbm [thread:$0]  %s991_s18, 16, %s993_s21, [#allocation3]  }
 0x2f4   :  { %v855_v51 = vpop.xlane.xlu0 %854 }
 0x2f5   :  { %v856_v46 = vsub.f32 %v849_v35, %v855_v51 }
 0x2f7   :  { %v857_v38 = vmul.f32 1.442695, %v856_v46 }
 0x2f9   :  { %1138 = vpow2.f32 %v857_v38 }
 0x2ff   :  { %v1139_v15 = vpop.eup %1138 }
 0x300   :  { %v859_v47 = vsel %vm852_vm1, %v1139_v15, 0.0 }
 0x301   :  { %860 = vadd.xlane.f32.xlu1 %v859_v47 }
 0x374   :  { %v861_v19 = vpop.xlane.xlu1 %860 }
 0x375   :  { %1140 = vrcp.f32 %v861_v19 }
 0x37b   :  { %v1141_v9 = vpop.eup %1140 }
 0x37c   :  { %v863_v12 = vmul.f32 %v1141_v9, %v1139_v15 }
 0x37e   :  { %880 = vmatmul.f32.vlgmr.msrb.gmra.mxu0 %v863_v12 }
 0x3fb   :  { %v881_v13 = vpop.f32.mrf.mxu0 }
 0x3fc   :  { %968 = vst.msk [vmem:[%s1863_s7] sm:$0x1] %vm966_vm2, %v881_v13  ;;  %916 = vmatmul.f32.vlgmr.msrb.gmra.mxu2 %v881_v13 }
 0x47f   :  { %v917_v16 = vpop.f32.mrf.mxu2 }
 0x480   :  { %v918_v20 = vadd.f32 %v917_v16, %v1771_v6 }
 0x482   :  { %v921_v21 = vsel %vm920_vm3, %v918_v20, -inf  ;;  %971 = vst.msk [vmem:[%s1863_s7 + $0x1] sm:$0x1] %vm969_vm4, %v918_v20 }
 0x483   :  { %922 = vmax.xlane.f32.xlu1 %v921_v21 }
 0x4f6   :  { %v923_v5 = vpop.xlane.xlu1 %922 }
 0x4f7   :  { %v924_v14 = vsub.f32 %v918_v20, %v923_v5  ;;  %vm947_vm5 = vcmp.eq.f32.partialorder %v918_v20, %v923_v5 }
 0x4f8   :  { %v948_v61 = vsel %vm947_vm5, %v946_v24, 2 }
 0x4f9   :  { %v925_v22 = vmul.f32 1.442695, %v924_v14  ;;  %v949_v26 = vsel %vm920_vm3, %v948_v61, 2147483647 }
 0x4fa   :  { %v951_v33 = vshra.s32 %v949_v26, 16  ;;  %v950_v10 = vand.u32 65535, %v949_v26 }
 0x4fb   :  { %1142 = vpow2.f32 %v925_v22 }
 0x4fc   :  { %v953_v34 = vcvt.s32.f32 %v951_v33  ;;  %v952_v39 = vcvt.s32.f32 %v950_v10 }
 0x501   :  { %v1143_v27 = vpop.eup %1142 }
 0x502   :  { %v927_v31 = vsel %vm920_vm3, %v1143_v27, 0.0 }
 0x503   :  { %928 = vadd.xlane.f32.xlu2 %v927_v31 }
 0x50b   :  { %954 = vmin.xlane.f32.xlu2 %v953_v34 }
 0x576   :  { %v929_v29 = vpop.xlane.xlu2 %928 }
 0x577   :  { %1144 = vrcp.f32 %v929_v29  ;;  %v941_v32 = vand.u32 2147483648, %v929_v29  ;;  %v939_v63 = vand.u32 2147483647, %v929_v29  ;;  %vm935_vm8 = vweird.f32 %v929_v29 }
 0x579   :  { %v942_v42 = vor.u32 1.1754944e-38, %v941_v32  ;;  %vm940_vm10 = vcmp.eq.f32.partialorder %v939_v63, 8.507059e+37 }
 0x57d   :  { %v1145_v37 = vpop.eup %1144 }
 0x57e   :  { %v931_v36 = vmul.f32 %v1145_v37, %v929_v29  ;;  %v955_v23 = vpop.xlane.xlu2 %954  ;;  %vm936_vm7 = vweird.f32 %v1145_v37 }
 0x57f   :  { %vm956_vm6 = vcmp.eq.f32.partialorder %v953_v34, %v955_v23  ;;  %vm937_vm9 = vmor %vm935_vm8, %vm936_vm7  ;;  %v961_v6 = vcvt.f32.s32 %v955_v23 }
 0x580   :  { %v932_v40 = vsub.f32 1.0, %v931_v36  ;;  %v957_v41 = vsel %vm956_vm6, %v952_v39, inf }
 0x581   :  { %958 = vmin.xlane.f32.xlu1 %v957_v41  ;;  %v962_v28 = vshll.u32 %v961_v6, 16 }
 0x582   :  { %v933_v0 = vmul.f32 %v1145_v37, %v932_v40 }
 0x584   :  { %v934_v17 = vadd.f32 %v1145_v37, %v933_v0 }
 0x586   :  { %v938_v7 = vsel %vm937_vm9, %v1145_v37, %v934_v17 }
 0x587   :  { %v943_v43 = vsel %vm940_vm10, %v942_v42, %v938_v7 }
 0x588   :  { %v944_v44 = vmul.f32 %v1143_v27, %v943_v43 }
 0x58a   :  { %973 = vrot.lane.b32.xlu2 %v944_v44, %s1174_s6 }
 0x5e4   :  { %v974_v45 = vpop.permute.xlu2 %973 }
 0x5e5   :  { %979 = vst.msk [vmem:[%s1863_s7 + $0x1] sm:$0x1] %vm978_vm13, %v974_v45 }
 0x5f4   :  { %v959_v30 = vpop.xlane.xlu1 %958 }
 0x5f5   :  { %v960_v25 = vcvt.f32.s32 %v959_v30 }
 0x5f7   :  { %v963_v18 = vadd.s32 %v962_v28, %v960_v25 }
 0x5f9   :  { %v980_v49 = vcvt.s32.f32 %v963_v18 }
 0x5fb   :  { %984 = vst.msk [vmem:[%s1863_s7 + $0x1] sm:$0x1] %vm983_vm0, %v980_v49 }
 0x5fc   :  { %1170 = dma.done.wait [#allocation3], 16  }
 0x5fd   :  { %1171 = vsyncadd [#allocation3], 4294967280 }
 0x5fe   :  { %1004 = vsyncpa [#allocation3], 1 }

</bundles_post_ra>
